<compile_context>
chip_gen: v5e
topology: v5e:2x2
jax: 0.10.0
libtpu: 0.0.40
codegen_flags: <defaults>
</compile_context>

<pallas_src>
import functools

import jax
import jax.numpy as jnp
from jax.experimental import pallas as pl
from jax.experimental.pallas import tpu as pltpu


def _largest_divisor_leq(n, cap):
    cap = max(1, min(n, cap))
    for cand in range(cap, 0, -1):
        if n % cand == 0:
            return cand
    return 1


def _peg_dwconv3d_kernel(*refs, causal: bool, d_tile: int, t_total: int,
                         mul_bf16: bool):
    """Depthwise 3x3x3 conv for one (batch, channel-tile, T-tile) grid step.

    non-causal refs: (w_ref, b_ref, xm1_ref, xc_ref, xp1_ref, o_ref)
    causal refs    : (w_ref, b_ref, xm2_ref, xm1_ref, xc_ref, o_ref)

      w_ref : (27, WD)      per-tap depthwise weight, tiled across W (lane-dense)
      b_ref : (1, WD)       bias, tiled across W
      x*    : (H, WD) or (TT, H, WD)   halo frames / current T tile
      o_ref : (TT, H, WD)
    """
    if causal:
        w_ref, b_ref, xm2_ref, xm1_ref, xc_ref, o_ref = refs
        xp1_ref = None
        pf = 2                                   # frame padding (2, 0)
    else:
        w_ref, b_ref, xm1_ref, xc_ref, xp1_ref, o_ref = refs
        xm2_ref = None
        pf = 1                                   # frame padding (1, 1)

    TT, H, WD = o_ref.shape
    D = d_tile
    mul_dt = jnp.bfloat16 if mul_bf16 else jnp.float32

    t0 = pl.program_id(2) * TT                   # absolute first frame of this tile

    # ---- hoisted once per grid step (NOT per output frame) -----------------
    # 27 tap weights: one (27, WD) load + cast, each row broadcast to (H, WD) once.
    w_all = w_ref[...].astype(mul_dt)
    w_b = [jnp.broadcast_to(w_all[tap:tap + 1, :], (H, WD)) for tap in range(27)]
    # Accumulator template = broadcast bias (saves one add per output frame).
    bias_b = jnp.broadcast_to(b_ref[...].astype(jnp.float32), (H, WD))

    # Edge masks for the in-kernel W / H zero halos.
    lane = jax.lax.broadcasted_iota(jnp.int32, (H, WD), 1)
    row = jax.lax.broadcasted_iota(jnp.int32, (H, WD), 0)
    w_ok_m = lane >= D                           # kw = 0 : neighbour w-1 exists
    w_ok_p = lane < (WD - D)                     # kw = 2 : neighbour w+1 exists
    h_ok_m = row >= 1                            # kh = 0 : neighbour h-1 exists
    h_ok_p = row < (H - 1)                       # kh = 2 : neighbour h+1 exists
    zero = jnp.zeros((), mul_dt)

    # Non-negative roll amounts (shift s: out[j] = in[(j - s) mod n]).
    sh_wm = D % WD                               # brings x[w-1] to position w
    sh_wp = (WD - D) % WD                        # brings x[w+1] to position w
    sh_hm = 1 % H
    sh_hp = (H - 1) % H

    def _roll(x, shift, axis):
        return x if shift == 0 else pltpu.roll(x, shift, axis=axis)

    def load_frame(li):
        # li = frame index relative to this T tile, in [-pf, TT - 1 + (1 - causal)].
        if li < 0:                               # leading temporal halo
            raw = (xm1_ref if li == -1 else xm2_ref)[...]
            valid = (t0 + li) >= 0
            return jnp.where(valid, raw.astype(mul_dt), zero)
        if li >= TT:                             # trailing temporal halo
            raw = xp1_ref[...]
            valid = (t0 + li) < t_total
            return jnp.where(valid, raw.astype(mul_dt), zero)
        return xc_ref[li].astype(mul_dt)

    def shifted_variants(f):
        # (kh, kw) -> (H, WD) operand, pre-shifted and zero-padded at the edges.
        g = [None, f, None]
        g[0] = jnp.where(w_ok_m, _roll(f, sh_wm, 1), zero)       # uses x[.., w-1, c]
        g[2] = jnp.where(w_ok_p, _roll(f, sh_wp, 1), zero)       # uses x[.., w+1, c]
        v = {}
        for kw in range(3):
            v[(1, kw)] = g[kw]
            v[(0, kw)] = jnp.where(h_ok_m, _roll(g[kw], sh_hm, 0), zero)   # h-1
            v[(2, kw)] = jnp.where(h_ok_p, _roll(g[kw], sh_hp, 0), zero)   # h+1
        return v

    # Rolling window: frames/variants built lazily on first use, so only ~3
    # frames' worth of shifted operands are live at any point of the unroll.
    variants = {}

    def get_variants(li):
        if li not in variants:
            variants[li] = shifted_variants(load_frame(li))
        return variants[li]

    for i in range(TT):
        acc = bias_b                             # (H, WD) f32
        for kt in range(3):
            v = get_variants(i + kt - pf)
            for kh in range(3):
                base = kt * 9 + kh * 3
                # 3 taps in mul_dt; a single convert + f32 add per (kt, kh) group.
                s = v[(kh, 0)] * w_b[base + 0]
                s = s + v[(kh, 1)] * w_b[base + 1]
                s = s + v[(kh, 2)] * w_b[base + 2]
                acc = acc + s.astype(jnp.float32)
        o_ref[i] = acc.astype(o_ref.dtype)


def peg_forward(x, weight, bias, shape=None, causal=False,
                t_tile=None, d_tile=None, multiply_in_bf16=False):
    """PEG forward.

    x      : (b, n, d) with `shape=(b, t, h, w)`, or (b, t, h, w, d)
    weight : (d, 1, 3, 3, 3)   PyTorch Conv3d depthwise weight layout
    bias   : (d,)
    """
    orig_shape = x.shape
    if x.ndim == 3:
        assert shape is not None, "3-D input requires shape=(b, t, h, w)"
        x = x.reshape(*shape, -1)
    assert x.ndim == 5
    b, t, h, w, d = x.shape

    # bf16 multiplies only help on v6e/v7x; v5e has no bf16 VALU -> force f32 there.
    mul_bf16 = bool(multiply_in_bf16) and x.dtype == jnp.bfloat16
    if mul_bf16:
        try:
            kind = jax.devices()[0].device_kind.lower()
            if ("v5 lite" in kind) or ("v5e" in kind) or ("v5lite" in kind):
                mul_bf16 = False
        except Exception:
            pass

    # ---- channel tiling: keep w * d_tile around <= 1024 lanes ---------------
    if d_tile is None:
        d_tile = _largest_divisor_leq(d, max(1, 1024 // max(w, 1)))
    assert d % d_tile == 0, "d_tile must divide the channel dimension"
    nd = d // d_tile
    wd = w * d_tile

    # ---- T tiling: biggest tile under a byte budget, capped at 16 frames ----
    frame_bytes = max(1, h * wd * x.dtype.itemsize)
    if t_tile is None:
        budget_frames = max(1, (4 * 1024 * 1024) // frame_bytes)
        t_tile = _largest_divisor_leq(t, min(16, budget_frames))
        # Guarantee >= 2 parallel grid steps where possible (v7x megacore).
        if b * nd * (t // t_tile) == 1 and t > 1:
            t_tile = _largest_divisor_leq(t, max(1, (t + 1) // 2))
    assert t % t_tile == 0, "t_tile must divide the number of frames"
    tt = t_tile
    n_t = t // tt

    # ---- lane-dense layout: (b, nd, t, h, w*d_tile) --------------------------
    # Free reshape for nd == 1; an XLA transpose pass (layout plumbing) otherwise.
    x5 = jnp.transpose(x.reshape(b, t, h, w, nd, d_tile),
                       (0, 4, 1, 2, 3, 5)).reshape(b, nd, t, h, wd)

    # Weights (d,1,3,3,3) -> tap-major (27, d) -> (nd, 27, d_tile) -> tiled across W.
    w_cl = jnp.transpose(weight[:, 0, :, :, :], (1, 2, 3, 0)).reshape(27, d)
    w_flat = jnp.tile(jnp.transpose(w_cl.reshape(27, nd, d_tile), (1, 0, 2)),
                      (1, 1, w))                                   # (nd, 27, wd)
    b_flat = jnp.tile(bias.reshape(nd, 1, d_tile), (1, 1, w))      # (nd, 1, wd)

    kernel = functools.partial(_peg_dwconv3d_kernel, causal=causal,
                               d_tile=d_tile, t_total=t, mul_bf16=mul_bf16)

    cur_spec = pl.BlockSpec((None, None, tt, h, wd), lambda i, c, j: (i, c, j, 0, 0))
    out_spec = pl.BlockSpec((None, None, tt, h, wd), lambda i, c, j: (i, c, j, 0, 0))
    prev1 = pl.BlockSpec((None, None, None, h, wd),
                         lambda i, c, j: (i, c, jnp.maximum(j * tt - 1, 0), 0, 0))
    if causal:
        prev2 = pl.BlockSpec((None, None, None, h, wd),
                             lambda i, c, j: (i, c, jnp.maximum(j * tt - 2, 0), 0, 0))
        x_specs = [prev2, prev1, cur_spec]
    else:
        next1 = pl.BlockSpec((None, None, None, h, wd),
                             lambda i, c, j: (i, c, jnp.minimum(j * tt + tt, t - 1), 0, 0))
        x_specs = [prev1, cur_spec, next1]

    w_spec = pl.BlockSpec((None, 27, wd), lambda i, c, j: (c, 0, 0))
    b_spec = pl.BlockSpec((None, 1, wd), lambda i, c, j: (c, 0, 0))

    # VMEM limit from the actual double-buffered blocks + in-kernel value slabs.
    vmem_need = (2 * 2 * tt * frame_bytes              # cur + out blocks, double-buffered
                 + 2 * 3 * frame_bytes                 # halo single-frame blocks
                 + 2 * 28 * wd * x.dtype.itemsize      # weights + bias blocks
                 + (27 + 27 + 4) * h * wd * 4)         # bcast weights, variant window, acc
    vmem_limit = int(min(max(vmem_need + (8 << 20), 16 << 20), 48 << 20))

    out5 = pl.pallas_call(
        kernel,
        out_shape=jax.ShapeDtypeStruct((b, nd, t, h, wd), x.dtype),
        grid_spec=pltpu.PrefetchScalarGridSpec(
            num_scalar_prefetch=0,
            grid=(b, nd, n_t),
            in_specs=[w_spec, b_spec] + x_specs,
            out_specs=out_spec,
        ),
        compiler_params=pltpu.CompilerParams(
            dimension_semantics=("parallel", "parallel", "parallel"),
            vmem_limit_bytes=vmem_limit,
        ),
        cost_estimate=pl.CostEstimate(
            flops=2 * 27 * b * t * h * w * d,
            transcendentals=0,
            bytes_accessed=int((2 * b * t * h * w * d
                                + 2 * b * t * h * wd // max(tt, 1)
                                + 28 * nd * wd) * x.dtype.itemsize),
        ),
    )(w_flat, b_flat, x5, x5, x5)

    out = jnp.transpose(out5.reshape(b, nd, t, h, w, d_tile),
                        (0, 2, 3, 4, 1, 5)).reshape(b, t, h, w, d)
    return out.reshape(orig_shape)


def _reference_peg(x, weight, bias, shape=None, causal=False):
    """Pure-JAX reference (same math, no Pallas) for correctness checks."""
    orig_shape = x.shape
    if x.ndim == 3:
        x = x.reshape(*shape, -1)
    b, t, h, w, d = x.shape
    frame_pad = (2, 0) if causal else (1, 1)
    xp = jnp.pad(x, ((0, 0), frame_pad, (1, 1), (1, 1), (0, 0)))
    acc = jnp.zeros((b, t, h, w, d), jnp.float32)
    for kt in range(3):
        for kh in range(3):
            for kw in range(3):
                acc = acc + xp[:, kt:kt + t, kh:kh + h, kw:kw + w, :].astype(
                    jnp.float32) * weight[:, 0, kt, kh, kw].astype(jnp.float32)
    acc = acc + bias.astype(jnp.float32)
    out = acc.astype(x.dtype)
    return out.reshape(orig_shape)


if __name__ == "__main__":
    key = jax.random.PRNGKey(0)
    k_x, k_w, k_b = jax.random.split(key, 3)

    # Small shapes: batch=2, frames=4, spatial=8x8, dim=32
    b, t, h, w, d = 2, 4, 8, 8, 32
    shape = (b, t, h, w)

    # x in the (b, n, d) "needs_shape" form, like the transformer usage.
    x = jax.random.normal(k_x, (b, t * h * w, d), dtype=jnp.float32)
    weight = jax.random.normal(k_w, (d, 1, 3, 3, 3), dtype=jnp.float32) * 0.1
    bias = jax.random.normal(k_b, (d,), dtype=jnp.float32) * 0.1

    ref = _reference_peg(x, weight, bias, shape=shape, causal=False)

    # Non-causal, default tiling.
    out = jax.block_until_ready(peg_forward(x, weight, bias, shape=shape, causal=False))
    assert out.shape == x.shape
    assert jnp.allclose(out, ref, atol=1e-4, rtol=1e-4), "non-causal mismatch"

    # Non-causal with explicit T-tiling (exercises the temporal halo masking path).
    out_t = jax.block_until_ready(
        peg_forward(x, weight, bias, shape=shape, causal=False, t_tile=2))
    assert jnp.allclose(out_t, ref, atol=1e-4, rtol=1e-4), "tiled non-causal mismatch"

    # Channel-tiled path (d_tile < d -> extra parallel grid axis).
    out_ct = jax.block_until_ready(
        peg_forward(x, weight, bias, shape=shape, causal=False, d_tile=8))
    assert jnp.allclose(out_ct, ref, atol=1e-4, rtol=1e-4), "channel-tiled mismatch"

    # Causal padding, with and without T-tiling.
    ref_c = _reference_peg(x, weight, bias, shape=shape, causal=True)
    out_c = jax.block_until_ready(
        peg_forward(x, weight, bias, shape=shape, causal=True))
    assert jnp.allclose(out_c, ref_c, atol=1e-4, rtol=1e-4), "causal mismatch"
    out_c1 = jax.block_until_ready(
        peg_forward(x, weight, bias, shape=shape, causal=True, t_tile=1))
    assert jnp.allclose(out_c1, ref_c, atol=1e-4, rtol=1e-4), "tiled causal mismatch"

    # Already-5D input form (needs_shape == False in the PyTorch module).
    x5d = x.reshape(b, t, h, w, d)
    out_5d = jax.block_until_ready(peg_forward(x5d, weight, bias, causal=False))
    assert out_5d.shape == x5d.shape
    assert jnp.allclose(out_5d.reshape(ref.shape), ref, atol=1e-4, rtol=1e-4), \
        "5-D input mismatch"

    # bf16 inputs (f32 multiply/accumulate path), looser tolerance.
    x_bf = x.astype(jnp.bfloat16)
    ref_bf = _reference_peg(x_bf, weight, bias, shape=shape, causal=False)
    out_bf = jax.block_until_ready(
        peg_forward(x_bf, weight, bias, shape=shape, causal=False))
    assert jnp.allclose(out_bf.astype(jnp.float32), ref_bf.astype(jnp.float32),
                        atol=3e-2, rtol=3e-2), "bf16 mismatch"

    print("KERNEL_OK")
</pallas_src>

<mosaic_0001>
module attributes {stable_mosaic.version = 11 : i64} {
  func.func @_peg_dwconv3d_kernel(%arg0: i32, %arg1: i32, %arg2: i32, %arg3: memref<1x27x256xf32, #tpu.memory_space<vmem>>, %arg4: memref<1x1x256xf32, #tpu.memory_space<vmem>>, %arg5: memref<1x1x1x8x256xf32, #tpu.memory_space<vmem>>, %arg6: memref<1x1x4x8x256xf32, #tpu.memory_space<vmem>>, %arg7: memref<1x1x1x8x256xf32, #tpu.memory_space<vmem>>, %arg8: memref<1x1x4x8x256xf32, #tpu.memory_space<vmem>>) attributes {dimension_semantics = [#tpu.dimension_semantics<parallel>, #tpu.dimension_semantics<parallel>, #tpu.dimension_semantics<parallel>], iteration_bounds = array<i64: 2, 1, 1>, scalar_prefetch = 0 : i64, scratch_operands = 0 : i64, tpu.core_type = #tpu.core_type<tc>, window_params = [{transform_indices = @transform_0, window_bounds = array<i64: 1, 27, 256>}, {transform_indices = @transform_1, window_bounds = array<i64: 1, 1, 256>}, {transform_indices = @transform_2, window_bounds = array<i64: 1, 1, 1, 8, 256>}, {transform_indices = @transform_3, window_bounds = array<i64: 1, 1, 4, 8, 256>}, {transform_indices = @transform_4, window_bounds = array<i64: 1, 1, 1, 8, 256>}, {transform_indices = @transform_5, window_bounds = array<i64: 1, 1, 4, 8, 256>}]} {
    %c4_i32 = arith.constant 4 : i32
    %0 = arith.muli %arg2, %c4_i32 : i32
    %c0 = arith.constant 0 : index
    %c0_0 = arith.constant 0 : index
    %c0_1 = arith.constant 0 : index
    %1 = vector.load %arg3[%c0, %c0_0, %c0_1] : memref<1x27x256xf32, #tpu.memory_space<vmem>>, vector<1x27x256xf32>
    %2 = vector.shape_cast %1 : vector<1x27x256xf32> to vector<27x256xf32>
    %3 = vector.extract_strided_slice %2 {offsets = [0, 0], sizes = [1, 256], strides = [1, 1]} : vector<27x256xf32> to vector<1x256xf32>
    %4 = vector.shape_cast %3 : vector<1x256xf32> to vector<1x256xf32>
    %5 = vector.broadcast %4 : vector<1x256xf32> to vector<8x256xf32>
    %6 = vector.extract_strided_slice %2 {offsets = [1, 0], sizes = [1, 256], strides = [1, 1]} : vector<27x256xf32> to vector<1x256xf32>
    %7 = vector.shape_cast %6 : vector<1x256xf32> to vector<1x256xf32>
    %8 = vector.broadcast %7 : vector<1x256xf32> to vector<8x256xf32>
    %9 = vector.extract_strided_slice %2 {offsets = [2, 0], sizes = [1, 256], strides = [1, 1]} : vector<27x256xf32> to vector<1x256xf32>
    %10 = vector.shape_cast %9 : vector<1x256xf32> to vector<1x256xf32>
    %11 = vector.broadcast %10 : vector<1x256xf32> to vector<8x256xf32>
    %12 = vector.extract_strided_slice %2 {offsets = [3, 0], sizes = [1, 256], strides = [1, 1]} : vector<27x256xf32> to vector<1x256xf32>
    %13 = vector.shape_cast %12 : vector<1x256xf32> to vector<1x256xf32>
    %14 = vector.broadcast %13 : vector<1x256xf32> to vector<8x256xf32>
    %15 = vector.extract_strided_slice %2 {offsets = [4, 0], sizes = [1, 256], strides = [1, 1]} : vector<27x256xf32> to vector<1x256xf32>
    %16 = vector.shape_cast %15 : vector<1x256xf32> to vector<1x256xf32>
    %17 = vector.broadcast %16 : vector<1x256xf32> to vector<8x256xf32>
    %18 = vector.extract_strided_slice %2 {offsets = [5, 0], sizes = [1, 256], strides = [1, 1]} : vector<27x256xf32> to vector<1x256xf32>
    %19 = vector.shape_cast %18 : vector<1x256xf32> to vector<1x256xf32>
    %20 = vector.broadcast %19 : vector<1x256xf32> to vector<8x256xf32>
    %21 = vector.extract_strided_slice %2 {offsets = [6, 0], sizes = [1, 256], strides = [1, 1]} : vector<27x256xf32> to vector<1x256xf32>
    %22 = vector.shape_cast %21 : vector<1x256xf32> to vector<1x256xf32>
    %23 = vector.broadcast %22 : vector<1x256xf32> to vector<8x256xf32>
    %24 = vector.extract_strided_slice %2 {offsets = [7, 0], sizes = [1, 256], strides = [1, 1]} : vector<27x256xf32> to vector<1x256xf32>
    %25 = vector.shape_cast %24 : vector<1x256xf32> to vector<1x256xf32>
    %26 = vector.broadcast %25 : vector<1x256xf32> to vector<8x256xf32>
    %27 = vector.extract_strided_slice %2 {offsets = [8, 0], sizes = [1, 256], strides = [1, 1]} : vector<27x256xf32> to vector<1x256xf32>
    %28 = vector.shape_cast %27 : vector<1x256xf32> to vector<1x256xf32>
    %29 = vector.broadcast %28 : vector<1x256xf32> to vector<8x256xf32>
    %30 = vector.extract_strided_slice %2 {offsets = [9, 0], sizes = [1, 256], strides = [1, 1]} : vector<27x256xf32> to vector<1x256xf32>
    %31 = vector.shape_cast %30 : vector<1x256xf32> to vector<1x256xf32>
    %32 = vector.broadcast %31 : vector<1x256xf32> to vector<8x256xf32>
    %33 = vector.extract_strided_slice %2 {offsets = [10, 0], sizes = [1, 256], strides = [1, 1]} : vector<27x256xf32> to vector<1x256xf32>
    %34 = vector.shape_cast %33 : vector<1x256xf32> to vector<1x256xf32>
    %35 = vector.broadcast %34 : vector<1x256xf32> to vector<8x256xf32>
    %36 = vector.extract_strided_slice %2 {offsets = [11, 0], sizes = [1, 256], strides = [1, 1]} : vector<27x256xf32> to vector<1x256xf32>
    %37 = vector.shape_cast %36 : vector<1x256xf32> to vector<1x256xf32>
    %38 = vector.broadcast %37 : vector<1x256xf32> to vector<8x256xf32>
    %39 = vector.extract_strided_slice %2 {offsets = [12, 0], sizes = [1, 256], strides = [1, 1]} : vector<27x256xf32> to vector<1x256xf32>
    %40 = vector.shape_cast %39 : vector<1x256xf32> to vector<1x256xf32>
    %41 = vector.broadcast %40 : vector<1x256xf32> to vector<8x256xf32>
    %42 = vector.extract_strided_slice %2 {offsets = [13, 0], sizes = [1, 256], strides = [1, 1]} : vector<27x256xf32> to vector<1x256xf32>
    %43 = vector.shape_cast %42 : vector<1x256xf32> to vector<1x256xf32>
    %44 = vector.broadcast %43 : vector<1x256xf32> to vector<8x256xf32>
    %45 = vector.extract_strided_slice %2 {offsets = [14, 0], sizes = [1, 256], strides = [1, 1]} : vector<27x256xf32> to vector<1x256xf32>
    %46 = vector.shape_cast %45 : vector<1x256xf32> to vector<1x256xf32>
    %47 = vector.broadcast %46 : vector<1x256xf32> to vector<8x256xf32>
    %48 = vector.extract_strided_slice %2 {offsets = [15, 0], sizes = [1, 256], strides = [1, 1]} : vector<27x256xf32> to vector<1x256xf32>
    %49 = vector.shape_cast %48 : vector<1x256xf32> to vector<1x256xf32>
    %50 = vector.broadcast %49 : vector<1x256xf32> to vector<8x256xf32>
    %51 = vector.extract_strided_slice %2 {offsets = [16, 0], sizes = [1, 256], strides = [1, 1]} : vector<27x256xf32> to vector<1x256xf32>
    %52 = vector.shape_cast %51 : vector<1x256xf32> to vector<1x256xf32>
    %53 = vector.broadcast %52 : vector<1x256xf32> to vector<8x256xf32>
    %54 = vector.extract_strided_slice %2 {offsets = [17, 0], sizes = [1, 256], strides = [1, 1]} : vector<27x256xf32> to vector<1x256xf32>
    %55 = vector.shape_cast %54 : vector<1x256xf32> to vector<1x256xf32>
    %56 = vector.broadcast %55 : vector<1x256xf32> to vector<8x256xf32>
    %57 = vector.extract_strided_slice %2 {offsets = [18, 0], sizes = [1, 256], strides = [1, 1]} : vector<27x256xf32> to vector<1x256xf32>
    %58 = vector.shape_cast %57 : vector<1x256xf32> to vector<1x256xf32>
    %59 = vector.broadcast %58 : vector<1x256xf32> to vector<8x256xf32>
    %60 = vector.extract_strided_slice %2 {offsets = [19, 0], sizes = [1, 256], strides = [1, 1]} : vector<27x256xf32> to vector<1x256xf32>
    %61 = vector.shape_cast %60 : vector<1x256xf32> to vector<1x256xf32>
    %62 = vector.broadcast %61 : vector<1x256xf32> to vector<8x256xf32>
    %63 = vector.extract_strided_slice %2 {offsets = [20, 0], sizes = [1, 256], strides = [1, 1]} : vector<27x256xf32> to vector<1x256xf32>
    %64 = vector.shape_cast %63 : vector<1x256xf32> to vector<1x256xf32>
    %65 = vector.broadcast %64 : vector<1x256xf32> to vector<8x256xf32>
    %66 = vector.extract_strided_slice %2 {offsets = [21, 0], sizes = [1, 256], strides = [1, 1]} : vector<27x256xf32> to vector<1x256xf32>
    %67 = vector.shape_cast %66 : vector<1x256xf32> to vector<1x256xf32>
    %68 = vector.broadcast %67 : vector<1x256xf32> to vector<8x256xf32>
    %69 = vector.extract_strided_slice %2 {offsets = [22, 0], sizes = [1, 256], strides = [1, 1]} : vector<27x256xf32> to vector<1x256xf32>
    %70 = vector.shape_cast %69 : vector<1x256xf32> to vector<1x256xf32>
    %71 = vector.broadcast %70 : vector<1x256xf32> to vector<8x256xf32>
    %72 = vector.extract_strided_slice %2 {offsets = [23, 0], sizes = [1, 256], strides = [1, 1]} : vector<27x256xf32> to vector<1x256xf32>
    %73 = vector.shape_cast %72 : vector<1x256xf32> to vector<1x256xf32>
    %74 = vector.broadcast %73 : vector<1x256xf32> to vector<8x256xf32>
    %75 = vector.extract_strided_slice %2 {offsets = [24, 0], sizes = [1, 256], strides = [1, 1]} : vector<27x256xf32> to vector<1x256xf32>
    %76 = vector.shape_cast %75 : vector<1x256xf32> to vector<1x256xf32>
    %77 = vector.broadcast %76 : vector<1x256xf32> to vector<8x256xf32>
    %78 = vector.extract_strided_slice %2 {offsets = [25, 0], sizes = [1, 256], strides = [1, 1]} : vector<27x256xf32> to vector<1x256xf32>
    %79 = vector.shape_cast %78 : vector<1x256xf32> to vector<1x256xf32>
    %80 = vector.broadcast %79 : vector<1x256xf32> to vector<8x256xf32>
    %81 = vector.extract_strided_slice %2 {offsets = [26, 0], sizes = [1, 256], strides = [1, 1]} : vector<27x256xf32> to vector<1x256xf32>
    %82 = vector.shape_cast %81 : vector<1x256xf32> to vector<1x256xf32>
    %83 = vector.broadcast %82 : vector<1x256xf32> to vector<8x256xf32>
    %c0_2 = arith.constant 0 : index
    %c0_3 = arith.constant 0 : index
    %c0_4 = arith.constant 0 : index
    %84 = vector.load %arg4[%c0_2, %c0_3, %c0_4] : memref<1x1x256xf32, #tpu.memory_space<vmem>>, vector<1x1x256xf32>
    %85 = vector.shape_cast %84 : vector<1x1x256xf32> to vector<1x256xf32>
    %86 = vector.shape_cast %85 : vector<1x256xf32> to vector<1x256xf32>
    %87 = vector.broadcast %86 : vector<1x256xf32> to vector<8x256xf32>
    %88 = tpu.iota {dimensions = array<i32: 1>} : vector<8x256xi32>
    %89 = tpu.iota {dimensions = array<i32: 0>} : vector<8x256xi32>
    %c32_i32 = arith.constant 32 : i32
    %90 = vector.broadcast %c32_i32 : i32 to vector<8x256xi32>
    %91 = arith.cmpi sge, %88, %90 : vector<8x256xi32>
    %c224_i32 = arith.constant 224 : i32
    %92 = vector.broadcast %c224_i32 : i32 to vector<8x256xi32>
    %93 = arith.cmpi slt, %88, %92 : vector<8x256xi32>
    %c1_i32 = arith.constant 1 : i32
    %94 = vector.broadcast %c1_i32 : i32 to vector<8x256xi32>
    %95 = arith.cmpi sge, %89, %94 : vector<8x256xi32>
    %c7_i32 = arith.constant 7 : i32
    %96 = vector.broadcast %c7_i32 : i32 to vector<8x256xi32>
    %97 = arith.cmpi slt, %89, %96 : vector<8x256xi32>
    %c0_5 = arith.constant 0 : index
    %c0_6 = arith.constant 0 : index
    %c0_7 = arith.constant 0 : index
    %c0_8 = arith.constant 0 : index
    %c0_9 = arith.constant 0 : index
    %98 = vector.load %arg5[%c0_5, %c0_6, %c0_7, %c0_8, %c0_9] : memref<1x1x1x8x256xf32, #tpu.memory_space<vmem>>, vector<1x1x1x8x256xf32>
    %99 = vector.shape_cast %98 : vector<1x1x1x8x256xf32> to vector<8x256xf32>
    %c-1_i32 = arith.constant -1 : i32
    %100 = arith.addi %0, %c-1_i32 : i32
    %c0_i32 = arith.constant 0 : i32
    %101 = arith.cmpi sge, %100, %c0_i32 : i32
    %cst = arith.constant 0.000000e+00 : f32
    %102 = vector.broadcast %cst : f32 to vector<8x256xf32>
    %103 = arith.select %101, %99, %102 : vector<8x256xf32>
    %c32_i32_10 = arith.constant 32 : i32
    %104 = tpu.dynamic_rotate %103 by %c32_i32_10 dim 1 : vector<8x256xf32>, i32 -> vector<8x256xf32>
    %cst_11 = arith.constant 0.000000e+00 : f32
    %105 = vector.broadcast %cst_11 : f32 to vector<8x256xf32>
    %106 = arith.select %91, %104, %105 : vector<8x256xi1>, vector<8x256xf32>
    %c224_i32_12 = arith.constant 224 : i32
    %107 = tpu.dynamic_rotate %103 by %c224_i32_12 dim 1 : vector<8x256xf32>, i32 -> vector<8x256xf32>
    %cst_13 = arith.constant 0.000000e+00 : f32
    %108 = vector.broadcast %cst_13 : f32 to vector<8x256xf32>
    %109 = arith.select %93, %107, %108 : vector<8x256xi1>, vector<8x256xf32>
    %c1_i32_14 = arith.constant 1 : i32
    %110 = tpu.dynamic_rotate %106 by %c1_i32_14 dim 0 : vector<8x256xf32>, i32 -> vector<8x256xf32>
    %cst_15 = arith.constant 0.000000e+00 : f32
    %111 = vector.broadcast %cst_15 : f32 to vector<8x256xf32>
    %112 = arith.select %95, %110, %111 : vector<8x256xi1>, vector<8x256xf32>
    %c7_i32_16 = arith.constant 7 : i32
    %113 = tpu.dynamic_rotate %106 by %c7_i32_16 dim 0 : vector<8x256xf32>, i32 -> vector<8x256xf32>
    %cst_17 = arith.constant 0.000000e+00 : f32
    %114 = vector.broadcast %cst_17 : f32 to vector<8x256xf32>
    %115 = arith.select %97, %113, %114 : vector<8x256xi1>, vector<8x256xf32>
    %c1_i32_18 = arith.constant 1 : i32
    %116 = tpu.dynamic_rotate %103 by %c1_i32_18 dim 0 : vector<8x256xf32>, i32 -> vector<8x256xf32>
    %cst_19 = arith.constant 0.000000e+00 : f32
    %117 = vector.broadcast %cst_19 : f32 to vector<8x256xf32>
    %118 = arith.select %95, %116, %117 : vector<8x256xi1>, vector<8x256xf32>
    %c7_i32_20 = arith.constant 7 : i32
    %119 = tpu.dynamic_rotate %103 by %c7_i32_20 dim 0 : vector<8x256xf32>, i32 -> vector<8x256xf32>
    %cst_21 = arith.constant 0.000000e+00 : f32
    %120 = vector.broadcast %cst_21 : f32 to vector<8x256xf32>
    %121 = arith.select %97, %119, %120 : vector<8x256xi1>, vector<8x256xf32>
    %c1_i32_22 = arith.constant 1 : i32
    %122 = tpu.dynamic_rotate %109 by %c1_i32_22 dim 0 : vector<8x256xf32>, i32 -> vector<8x256xf32>
    %cst_23 = arith.constant 0.000000e+00 : f32
    %123 = vector.broadcast %cst_23 : f32 to vector<8x256xf32>
    %124 = arith.select %95, %122, %123 : vector<8x256xi1>, vector<8x256xf32>
    %c7_i32_24 = arith.constant 7 : i32
    %125 = tpu.dynamic_rotate %109 by %c7_i32_24 dim 0 : vector<8x256xf32>, i32 -> vector<8x256xf32>
    %cst_25 = arith.constant 0.000000e+00 : f32
    %126 = vector.broadcast %cst_25 : f32 to vector<8x256xf32>
    %127 = arith.select %97, %125, %126 : vector<8x256xi1>, vector<8x256xf32>
    %128 = arith.mulf %112, %5 : vector<8x256xf32>
    %129 = arith.mulf %118, %8 : vector<8x256xf32>
    %130 = arith.addf %128, %129 : vector<8x256xf32>
    %131 = arith.mulf %124, %11 : vector<8x256xf32>
    %132 = arith.addf %130, %131 : vector<8x256xf32>
    %133 = arith.addf %87, %132 : vector<8x256xf32>
    %134 = arith.mulf %106, %14 : vector<8x256xf32>
    %135 = arith.mulf %103, %17 : vector<8x256xf32>
    %136 = arith.addf %134, %135 : vector<8x256xf32>
    %137 = arith.mulf %109, %20 : vector<8x256xf32>
    %138 = arith.addf %136, %137 : vector<8x256xf32>
    %139 = arith.addf %133, %138 : vector<8x256xf32>
    %140 = arith.mulf %115, %23 : vector<8x256xf32>
    %141 = arith.mulf %121, %26 : vector<8x256xf32>
    %142 = arith.addf %140, %141 : vector<8x256xf32>
    %143 = arith.mulf %127, %29 : vector<8x256xf32>
    %144 = arith.addf %142, %143 : vector<8x256xf32>
    %145 = arith.addf %139, %144 : vector<8x256xf32>
    %c0_26 = arith.constant 0 : index
    %c0_27 = arith.constant 0 : index
    %c0_28 = arith.constant 0 : index
    %c0_29 = arith.constant 0 : index
    %c0_30 = arith.constant 0 : index
    %146 = vector.load %arg6[%c0_26, %c0_27, %c0_28, %c0_29, %c0_30] : memref<1x1x4x8x256xf32, #tpu.memory_space<vmem>>, vector<1x1x1x8x256xf32>
    %147 = vector.shape_cast %146 : vector<1x1x1x8x256xf32> to vector<8x256xf32>
    %c32_i32_31 = arith.constant 32 : i32
    %148 = tpu.dynamic_rotate %147 by %c32_i32_31 dim 1 : vector<8x256xf32>, i32 -> vector<8x256xf32>
    %cst_32 = arith.constant 0.000000e+00 : f32
    %149 = vector.broadcast %cst_32 : f32 to vector<8x256xf32>
    %150 = arith.select %91, %148, %149 : vector<8x256xi1>, vector<8x256xf32>
    %c224_i32_33 = arith.constant 224 : i32
    %151 = tpu.dynamic_rotate %147 by %c224_i32_33 dim 1 : vector<8x256xf32>, i32 -> vector<8x256xf32>
    %cst_34 = arith.constant 0.000000e+00 : f32
    %152 = vector.broadcast %cst_34 : f32 to vector<8x256xf32>
    %153 = arith.select %93, %151, %152 : vector<8x256xi1>, vector<8x256xf32>
    %c1_i32_35 = arith.constant 1 : i32
    %154 = tpu.dynamic_rotate %150 by %c1_i32_35 dim 0 : vector<8x256xf32>, i32 -> vector<8x256xf32>
    %cst_36 = arith.constant 0.000000e+00 : f32
    %155 = vector.broadcast %cst_36 : f32 to vector<8x256xf32>
    %156 = arith.select %95, %154, %155 : vector<8x256xi1>, vector<8x256xf32>
    %c7_i32_37 = arith.constant 7 : i32
    %157 = tpu.dynamic_rotate %150 by %c7_i32_37 dim 0 : vector<8x256xf32>, i32 -> vector<8x256xf32>
    %cst_38 = arith.constant 0.000000e+00 : f32
    %158 = vector.broadcast %cst_38 : f32 to vector<8x256xf32>
    %159 = arith.select %97, %157, %158 : vector<8x256xi1>, vector<8x256xf32>
    %c1_i32_39 = arith.constant 1 : i32
    %160 = tpu.dynamic_rotate %147 by %c1_i32_39 dim 0 : vector<8x256xf32>, i32 -> vector<8x256xf32>
    %cst_40 = arith.constant 0.000000e+00 : f32
    %161 = vector.broadcast %cst_40 : f32 to vector<8x256xf32>
    %162 = arith.select %95, %160, %161 : vector<8x256xi1>, vector<8x256xf32>
    %c7_i32_41 = arith.constant 7 : i32
    %163 = tpu.dynamic_rotate %147 by %c7_i32_41 dim 0 : vector<8x256xf32>, i32 -> vector<8x256xf32>
    %cst_42 = arith.constant 0.000000e+00 : f32
    %164 = vector.broadcast %cst_42 : f32 to vector<8x256xf32>
    %165 = arith.select %97, %163, %164 : vector<8x256xi1>, vector<8x256xf32>
    %c1_i32_43 = arith.constant 1 : i32
    %166 = tpu.dynamic_rotate %153 by %c1_i32_43 dim 0 : vector<8x256xf32>, i32 -> vector<8x256xf32>
    %cst_44 = arith.constant 0.000000e+00 : f32
    %167 = vector.broadcast %cst_44 : f32 to vector<8x256xf32>
    %168 = arith.select %95, %166, %167 : vector<8x256xi1>, vector<8x256xf32>
    %c7_i32_45 = arith.constant 7 : i32
    %169 = tpu.dynamic_rotate %153 by %c7_i32_45 dim 0 : vector<8x256xf32>, i32 -> vector<8x256xf32>
    %cst_46 = arith.constant 0.000000e+00 : f32
    %170 = vector.broadcast %cst_46 : f32 to vector<8x256xf32>
    %171 = arith.select %97, %169, %170 : vector<8x256xi1>, vector<8x256xf32>
    %172 = arith.mulf %156, %32 : vector<8x256xf32>
    %173 = arith.mulf %162, %35 : vector<8x256xf32>
    %174 = arith.addf %172, %173 : vector<8x256xf32>
    %175 = arith.mulf %168, %38 : vector<8x256xf32>
    %176 = arith.addf %174, %175 : vector<8x256xf32>
    %177 = arith.addf %145, %176 : vector<8x256xf32>
    %178 = arith.mulf %150, %41 : vector<8x256xf32>
    %179 = arith.mulf %147, %44 : vector<8x256xf32>
    %180 = arith.addf %178, %179 : vector<8x256xf32>
    %181 = arith.mulf %153, %47 : vector<8x256xf32>
    %182 = arith.addf %180, %181 : vector<8x256xf32>
    %183 = arith.addf %177, %182 : vector<8x256xf32>
    %184 = arith.mulf %159, %50 : vector<8x256xf32>
    %185 = arith.mulf %165, %53 : vector<8x256xf32>
    %186 = arith.addf %184, %185 : vector<8x256xf32>
    %187 = arith.mulf %171, %56 : vector<8x256xf32>
    %188 = arith.addf %186, %187 : vector<8x256xf32>
    %189 = arith.addf %183, %188 : vector<8x256xf32>
    %c0_47 = arith.constant 0 : index
    %c0_48 = arith.constant 0 : index
    %c1 = arith.constant 1 : index
    %c0_49 = arith.constant 0 : index
    %c0_50 = arith.constant 0 : index
    %190 = vector.load %arg6[%c0_47, %c0_48, %c1, %c0_49, %c0_50] : memref<1x1x4x8x256xf32, #tpu.memory_space<vmem>>, vector<1x1x1x8x256xf32>
    %191 = vector.shape_cast %190 : vector<1x1x1x8x256xf32> to vector<8x256xf32>
    %c32_i32_51 = arith.constant 32 : i32
    %192 = tpu.dynamic_rotate %191 by %c32_i32_51 dim 1 : vector<8x256xf32>, i32 -> vector<8x256xf32>
    %cst_52 = arith.constant 0.000000e+00 : f32
    %193 = vector.broadcast %cst_52 : f32 to vector<8x256xf32>
    %194 = arith.select %91, %192, %193 : vector<8x256xi1>, vector<8x256xf32>
    %c224_i32_53 = arith.constant 224 : i32
    %195 = tpu.dynamic_rotate %191 by %c224_i32_53 dim 1 : vector<8x256xf32>, i32 -> vector<8x256xf32>
    %cst_54 = arith.constant 0.000000e+00 : f32
    %196 = vector.broadcast %cst_54 : f32 to vector<8x256xf32>
    %197 = arith.select %93, %195, %196 : vector<8x256xi1>, vector<8x256xf32>
    %c1_i32_55 = arith.constant 1 : i32
    %198 = tpu.dynamic_rotate %194 by %c1_i32_55 dim 0 : vector<8x256xf32>, i32 -> vector<8x256xf32>
    %cst_56 = arith.constant 0.000000e+00 : f32
    %199 = vector.broadcast %cst_56 : f32 to vector<8x256xf32>
    %200 = arith.select %95, %198, %199 : vector<8x256xi1>, vector<8x256xf32>
    %c7_i32_57 = arith.constant 7 : i32
    %201 = tpu.dynamic_rotate %194 by %c7_i32_57 dim 0 : vector<8x256xf32>, i32 -> vector<8x256xf32>
    %cst_58 = arith.constant 0.000000e+00 : f32
    %202 = vector.broadcast %cst_58 : f32 to vector<8x256xf32>
    %203 = arith.select %97, %201, %202 : vector<8x256xi1>, vector<8x256xf32>
    %c1_i32_59 = arith.constant 1 : i32
    %204 = tpu.dynamic_rotate %191 by %c1_i32_59 dim 0 : vector<8x256xf32>, i32 -> vector<8x256xf32>
    %cst_60 = arith.constant 0.000000e+00 : f32
    %205 = vector.broadcast %cst_60 : f32 to vector<8x256xf32>
    %206 = arith.select %95, %204, %205 : vector<8x256xi1>, vector<8x256xf32>
    %c7_i32_61 = arith.constant 7 : i32
    %207 = tpu.dynamic_rotate %191 by %c7_i32_61 dim 0 : vector<8x256xf32>, i32 -> vector<8x256xf32>
    %cst_62 = arith.constant 0.000000e+00 : f32
    %208 = vector.broadcast %cst_62 : f32 to vector<8x256xf32>
    %209 = arith.select %97, %207, %208 : vector<8x256xi1>, vector<8x256xf32>
    %c1_i32_63 = arith.constant 1 : i32
    %210 = tpu.dynamic_rotate %197 by %c1_i32_63 dim 0 : vector<8x256xf32>, i32 -> vector<8x256xf32>
    %cst_64 = arith.constant 0.000000e+00 : f32
    %211 = vector.broadcast %cst_64 : f32 to vector<8x256xf32>
    %212 = arith.select %95, %210, %211 : vector<8x256xi1>, vector<8x256xf32>
    %c7_i32_65 = arith.constant 7 : i32
    %213 = tpu.dynamic_rotate %197 by %c7_i32_65 dim 0 : vector<8x256xf32>, i32 -> vector<8x256xf32>
    %cst_66 = arith.constant 0.000000e+00 : f32
    %214 = vector.broadcast %cst_66 : f32 to vector<8x256xf32>
    %215 = arith.select %97, %213, %214 : vector<8x256xi1>, vector<8x256xf32>
    %216 = arith.mulf %200, %59 : vector<8x256xf32>
    %217 = arith.mulf %206, %62 : vector<8x256xf32>
    %218 = arith.addf %216, %217 : vector<8x256xf32>
    %219 = arith.mulf %212, %65 : vector<8x256xf32>
    %220 = arith.addf %218, %219 : vector<8x256xf32>
    %221 = arith.addf %189, %220 : vector<8x256xf32>
    %222 = arith.mulf %194, %68 : vector<8x256xf32>
    %223 = arith.mulf %191, %71 : vector<8x256xf32>
    %224 = arith.addf %222, %223 : vector<8x256xf32>
    %225 = arith.mulf %197, %74 : vector<8x256xf32>
    %226 = arith.addf %224, %225 : vector<8x256xf32>
    %227 = arith.addf %221, %226 : vector<8x256xf32>
    %228 = arith.mulf %203, %77 : vector<8x256xf32>
    %229 = arith.mulf %209, %80 : vector<8x256xf32>
    %230 = arith.addf %228, %229 : vector<8x256xf32>
    %231 = arith.mulf %215, %83 : vector<8x256xf32>
    %232 = arith.addf %230, %231 : vector<8x256xf32>
    %233 = arith.addf %227, %232 : vector<8x256xf32>
    %c0_67 = arith.constant 0 : index
    %c0_68 = arith.constant 0 : index
    %c0_69 = arith.constant 0 : index
    %c0_70 = arith.constant 0 : index
    %c0_71 = arith.constant 0 : index
    %234 = vector.load %arg8[%c0_67, %c0_68, %c0_69, %c0_70, %c0_71] : memref<1x1x4x8x256xf32, #tpu.memory_space<vmem>>, vector<1x1x1x8x256xf32>
    %235 = vector.shape_cast %234 : vector<1x1x1x8x256xf32> to vector<8x256xf32>
    %236 = vector.shape_cast %233 : vector<8x256xf32> to vector<1x1x1x8x256xf32>
    tpu.vector_store %arg8[%c0_67, %c0_68, %c0_69, %c0_70, %c0_71], %236 {strides = array<i32>} : memref<1x1x4x8x256xf32, #tpu.memory_space<vmem>>, vector<1x1x1x8x256xf32>,
    %237 = arith.mulf %156, %5 : vector<8x256xf32>
    %238 = arith.mulf %162, %8 : vector<8x256xf32>
    %239 = arith.addf %237, %238 : vector<8x256xf32>
    %240 = arith.mulf %168, %11 : vector<8x256xf32>
    %241 = arith.addf %239, %240 : vector<8x256xf32>
    %242 = arith.addf %87, %241 : vector<8x256xf32>
    %243 = arith.mulf %150, %14 : vector<8x256xf32>
    %244 = arith.mulf %147, %17 : vector<8x256xf32>
    %245 = arith.addf %243, %244 : vector<8x256xf32>
    %246 = arith.mulf %153, %20 : vector<8x256xf32>
    %247 = arith.addf %245, %246 : vector<8x256xf32>
    %248 = arith.addf %242, %247 : vector<8x256xf32>
    %249 = arith.mulf %159, %23 : vector<8x256xf32>
    %250 = arith.mulf %165, %26 : vector<8x256xf32>
    %251 = arith.addf %249, %250 : vector<8x256xf32>
    %252 = arith.mulf %171, %29 : vector<8x256xf32>
    %253 = arith.addf %251, %252 : vector<8x256xf32>
    %254 = arith.addf %248, %253 : vector<8x256xf32>
    %255 = arith.mulf %200, %32 : vector<8x256xf32>
    %256 = arith.mulf %206, %35 : vector<8x256xf32>
    %257 = arith.addf %255, %256 : vector<8x256xf32>
    %258 = arith.mulf %212, %38 : vector<8x256xf32>
    %259 = arith.addf %257, %258 : vector<8x256xf32>
    %260 = arith.addf %254, %259 : vector<8x256xf32>
    %261 = arith.mulf %194, %41 : vector<8x256xf32>
    %262 = arith.mulf %191, %44 : vector<8x256xf32>
    %263 = arith.addf %261, %262 : vector<8x256xf32>
    %264 = arith.mulf %197, %47 : vector<8x256xf32>
    %265 = arith.addf %263, %264 : vector<8x256xf32>
    %266 = arith.addf %260, %265 : vector<8x256xf32>
    %267 = arith.mulf %203, %50 : vector<8x256xf32>
    %268 = arith.mulf %209, %53 : vector<8x256xf32>
    %269 = arith.addf %267, %268 : vector<8x256xf32>
    %270 = arith.mulf %215, %56 : vector<8x256xf32>
    %271 = arith.addf %269, %270 : vector<8x256xf32>
    %272 = arith.addf %266, %271 : vector<8x256xf32>
    %c0_72 = arith.constant 0 : index
    %c0_73 = arith.constant 0 : index
    %c2 = arith.constant 2 : index
    %c0_74 = arith.constant 0 : index
    %c0_75 = arith.constant 0 : index
    %273 = vector.load %arg6[%c0_72, %c0_73, %c2, %c0_74, %c0_75] : memref<1x1x4x8x256xf32, #tpu.memory_space<vmem>>, vector<1x1x1x8x256xf32>
    %274 = vector.shape_cast %273 : vector<1x1x1x8x256xf32> to vector<8x256xf32>
    %c32_i32_76 = arith.constant 32 : i32
    %275 = tpu.dynamic_rotate %274 by %c32_i32_76 dim 1 : vector<8x256xf32>, i32 -> vector<8x256xf32>
    %cst_77 = arith.constant 0.000000e+00 : f32
    %276 = vector.broadcast %cst_77 : f32 to vector<8x256xf32>
    %277 = arith.select %91, %275, %276 : vector<8x256xi1>, vector<8x256xf32>
    %c224_i32_78 = arith.constant 224 : i32
    %278 = tpu.dynamic_rotate %274 by %c224_i32_78 dim 1 : vector<8x256xf32>, i32 -> vector<8x256xf32>
    %cst_79 = arith.constant 0.000000e+00 : f32
    %279 = vector.broadcast %cst_79 : f32 to vector<8x256xf32>
    %280 = arith.select %93, %278, %279 : vector<8x256xi1>, vector<8x256xf32>
    %c1_i32_80 = arith.constant 1 : i32
    %281 = tpu.dynamic_rotate %277 by %c1_i32_80 dim 0 : vector<8x256xf32>, i32 -> vector<8x256xf32>
    %cst_81 = arith.constant 0.000000e+00 : f32
    %282 = vector.broadcast %cst_81 : f32 to vector<8x256xf32>
    %283 = arith.select %95, %281, %282 : vector<8x256xi1>, vector<8x256xf32>
    %c7_i32_82 = arith.constant 7 : i32
    %284 = tpu.dynamic_rotate %277 by %c7_i32_82 dim 0 : vector<8x256xf32>, i32 -> vector<8x256xf32>
    %cst_83 = arith.constant 0.000000e+00 : f32
    %285 = vector.broadcast %cst_83 : f32 to vector<8x256xf32>
    %286 = arith.select %97, %284, %285 : vector<8x256xi1>, vector<8x256xf32>
    %c1_i32_84 = arith.constant 1 : i32
    %287 = tpu.dynamic_rotate %274 by %c1_i32_84 dim 0 : vector<8x256xf32>, i32 -> vector<8x256xf32>
    %cst_85 = arith.constant 0.000000e+00 : f32
    %288 = vector.broadcast %cst_85 : f32 to vector<8x256xf32>
    %289 = arith.select %95, %287, %288 : vector<8x256xi1>, vector<8x256xf32>
    %c7_i32_86 = arith.constant 7 : i32
    %290 = tpu.dynamic_rotate %274 by %c7_i32_86 dim 0 : vector<8x256xf32>, i32 -> vector<8x256xf32>
    %cst_87 = arith.constant 0.000000e+00 : f32
    %291 = vector.broadcast %cst_87 : f32 to vector<8x256xf32>
    %292 = arith.select %97, %290, %291 : vector<8x256xi1>, vector<8x256xf32>
    %c1_i32_88 = arith.constant 1 : i32
    %293 = tpu.dynamic_rotate %280 by %c1_i32_88 dim 0 : vector<8x256xf32>, i32 -> vector<8x256xf32>
    %cst_89 = arith.constant 0.000000e+00 : f32
    %294 = vector.broadcast %cst_89 : f32 to vector<8x256xf32>
    %295 = arith.select %95, %293, %294 : vector<8x256xi1>, vector<8x256xf32>
    %c7_i32_90 = arith.constant 7 : i32
    %296 = tpu.dynamic_rotate %280 by %c7_i32_90 dim 0 : vector<8x256xf32>, i32 -> vector<8x256xf32>
    %cst_91 = arith.constant 0.000000e+00 : f32
    %297 = vector.broadcast %cst_91 : f32 to vector<8x256xf32>
    %298 = arith.select %97, %296, %297 : vector<8x256xi1>, vector<8x256xf32>
    %299 = arith.mulf %283, %59 : vector<8x256xf32>
    %300 = arith.mulf %289, %62 : vector<8x256xf32>
    %301 = arith.addf %299, %300 : vector<8x256xf32>
    %302 = arith.mulf %295, %65 : vector<8x256xf32>
    %303 = arith.addf %301, %302 : vector<8x256xf32>
    %304 = arith.addf %272, %303 : vector<8x256xf32>
    %305 = arith.mulf %277, %68 : vector<8x256xf32>
    %306 = arith.mulf %274, %71 : vector<8x256xf32>
    %307 = arith.addf %305, %306 : vector<8x256xf32>
    %308 = arith.mulf %280, %74 : vector<8x256xf32>
    %309 = arith.addf %307, %308 : vector<8x256xf32>
    %310 = arith.addf %304, %309 : vector<8x256xf32>
    %311 = arith.mulf %286, %77 : vector<8x256xf32>
    %312 = arith.mulf %292, %80 : vector<8x256xf32>
    %313 = arith.addf %311, %312 : vector<8x256xf32>
    %314 = arith.mulf %298, %83 : vector<8x256xf32>
    %315 = arith.addf %313, %314 : vector<8x256xf32>
    %316 = arith.addf %310, %315 : vector<8x256xf32>
    %c0_92 = arith.constant 0 : index
    %c0_93 = arith.constant 0 : index
    %c1_94 = arith.constant 1 : index
    %c0_95 = arith.constant 0 : index
    %c0_96 = arith.constant 0 : index
    %317 = vector.load %arg8[%c0_92, %c0_93, %c1_94, %c0_95, %c0_96] : memref<1x1x4x8x256xf32, #tpu.memory_space<vmem>>, vector<1x1x1x8x256xf32>
    %318 = vector.shape_cast %317 : vector<1x1x1x8x256xf32> to vector<8x256xf32>
    %319 = vector.shape_cast %316 : vector<8x256xf32> to vector<1x1x1x8x256xf32>
    tpu.vector_store %arg8[%c0_92, %c0_93, %c1_94, %c0_95, %c0_96], %319 {strides = array<i32>} : memref<1x1x4x8x256xf32, #tpu.memory_space<vmem>>, vector<1x1x1x8x256xf32>,
    %320 = arith.mulf %200, %5 : vector<8x256xf32>
    %321 = arith.mulf %206, %8 : vector<8x256xf32>
    %322 = arith.addf %320, %321 : vector<8x256xf32>
    %323 = arith.mulf %212, %11 : vector<8x256xf32>
    %324 = arith.addf %322, %323 : vector<8x256xf32>
    %325 = arith.addf %87, %324 : vector<8x256xf32>
    %326 = arith.mulf %194, %14 : vector<8x256xf32>
    %327 = arith.mulf %191, %17 : vector<8x256xf32>
    %328 = arith.addf %326, %327 : vector<8x256xf32>
    %329 = arith.mulf %197, %20 : vector<8x256xf32>
    %330 = arith.addf %328, %329 : vector<8x256xf32>
    %331 = arith.addf %325, %330 : vector<8x256xf32>
    %332 = arith.mulf %203, %23 : vector<8x256xf32>
    %333 = arith.mulf %209, %26 : vector<8x256xf32>
    %334 = arith.addf %332, %333 : vector<8x256xf32>
    %335 = arith.mulf %215, %29 : vector<8x256xf32>
    %336 = arith.addf %334, %335 : vector<8x256xf32>
    %337 = arith.addf %331, %336 : vector<8x256xf32>
    %338 = arith.mulf %283, %32 : vector<8x256xf32>
    %339 = arith.mulf %289, %35 : vector<8x256xf32>
    %340 = arith.addf %338, %339 : vector<8x256xf32>
    %341 = arith.mulf %295, %38 : vector<8x256xf32>
    %342 = arith.addf %340, %341 : vector<8x256xf32>
    %343 = arith.addf %337, %342 : vector<8x256xf32>
    %344 = arith.mulf %277, %41 : vector<8x256xf32>
    %345 = arith.mulf %274, %44 : vector<8x256xf32>
    %346 = arith.addf %344, %345 : vector<8x256xf32>
    %347 = arith.mulf %280, %47 : vector<8x256xf32>
    %348 = arith.addf %346, %347 : vector<8x256xf32>
    %349 = arith.addf %343, %348 : vector<8x256xf32>
    %350 = arith.mulf %286, %50 : vector<8x256xf32>
    %351 = arith.mulf %292, %53 : vector<8x256xf32>
    %352 = arith.addf %350, %351 : vector<8x256xf32>
    %353 = arith.mulf %298, %56 : vector<8x256xf32>
    %354 = arith.addf %352, %353 : vector<8x256xf32>
    %355 = arith.addf %349, %354 : vector<8x256xf32>
    %c0_97 = arith.constant 0 : index
    %c0_98 = arith.constant 0 : index
    %c3 = arith.constant 3 : index
    %c0_99 = arith.constant 0 : index
    %c0_100 = arith.constant 0 : index
    %356 = vector.load %arg6[%c0_97, %c0_98, %c3, %c0_99, %c0_100] : memref<1x1x4x8x256xf32, #tpu.memory_space<vmem>>, vector<1x1x1x8x256xf32>
    %357 = vector.shape_cast %356 : vector<1x1x1x8x256xf32> to vector<8x256xf32>
    %c32_i32_101 = arith.constant 32 : i32
    %358 = tpu.dynamic_rotate %357 by %c32_i32_101 dim 1 : vector<8x256xf32>, i32 -> vector<8x256xf32>
    %cst_102 = arith.constant 0.000000e+00 : f32
    %359 = vector.broadcast %cst_102 : f32 to vector<8x256xf32>
    %360 = arith.select %91, %358, %359 : vector<8x256xi1>, vector<8x256xf32>
    %c224_i32_103 = arith.constant 224 : i32
    %361 = tpu.dynamic_rotate %357 by %c224_i32_103 dim 1 : vector<8x256xf32>, i32 -> vector<8x256xf32>
    %cst_104 = arith.constant 0.000000e+00 : f32
    %362 = vector.broadcast %cst_104 : f32 to vector<8x256xf32>
    %363 = arith.select %93, %361, %362 : vector<8x256xi1>, vector<8x256xf32>
    %c1_i32_105 = arith.constant 1 : i32
    %364 = tpu.dynamic_rotate %360 by %c1_i32_105 dim 0 : vector<8x256xf32>, i32 -> vector<8x256xf32>
    %cst_106 = arith.constant 0.000000e+00 : f32
    %365 = vector.broadcast %cst_106 : f32 to vector<8x256xf32>
    %366 = arith.select %95, %364, %365 : vector<8x256xi1>, vector<8x256xf32>
    %c7_i32_107 = arith.constant 7 : i32
    %367 = tpu.dynamic_rotate %360 by %c7_i32_107 dim 0 : vector<8x256xf32>, i32 -> vector<8x256xf32>
    %cst_108 = arith.constant 0.000000e+00 : f32
    %368 = vector.broadcast %cst_108 : f32 to vector<8x256xf32>
    %369 = arith.select %97, %367, %368 : vector<8x256xi1>, vector<8x256xf32>
    %c1_i32_109 = arith.constant 1 : i32
    %370 = tpu.dynamic_rotate %357 by %c1_i32_109 dim 0 : vector<8x256xf32>, i32 -> vector<8x256xf32>
    %cst_110 = arith.constant 0.000000e+00 : f32
    %371 = vector.broadcast %cst_110 : f32 to vector<8x256xf32>
    %372 = arith.select %95, %370, %371 : vector<8x256xi1>, vector<8x256xf32>
    %c7_i32_111 = arith.constant 7 : i32
    %373 = tpu.dynamic_rotate %357 by %c7_i32_111 dim 0 : vector<8x256xf32>, i32 -> vector<8x256xf32>
    %cst_112 = arith.constant 0.000000e+00 : f32
    %374 = vector.broadcast %cst_112 : f32 to vector<8x256xf32>
    %375 = arith.select %97, %373, %374 : vector<8x256xi1>, vector<8x256xf32>
    %c1_i32_113 = arith.constant 1 : i32
    %376 = tpu.dynamic_rotate %363 by %c1_i32_113 dim 0 : vector<8x256xf32>, i32 -> vector<8x256xf32>
    %cst_114 = arith.constant 0.000000e+00 : f32
    %377 = vector.broadcast %cst_114 : f32 to vector<8x256xf32>
    %378 = arith.select %95, %376, %377 : vector<8x256xi1>, vector<8x256xf32>
    %c7_i32_115 = arith.constant 7 : i32
    %379 = tpu.dynamic_rotate %363 by %c7_i32_115 dim 0 : vector<8x256xf32>, i32 -> vector<8x256xf32>
    %cst_116 = arith.constant 0.000000e+00 : f32
    %380 = vector.broadcast %cst_116 : f32 to vector<8x256xf32>
    %381 = arith.select %97, %379, %380 : vector<8x256xi1>, vector<8x256xf32>
    %382 = arith.mulf %366, %59 : vector<8x256xf32>
    %383 = arith.mulf %372, %62 : vector<8x256xf32>
    %384 = arith.addf %382, %383 : vector<8x256xf32>
    %385 = arith.mulf %378, %65 : vector<8x256xf32>
    %386 = arith.addf %384, %385 : vector<8x256xf32>
    %387 = arith.addf %355, %386 : vector<8x256xf32>
    %388 = arith.mulf %360, %68 : vector<8x256xf32>
    %389 = arith.mulf %357, %71 : vector<8x256xf32>
    %390 = arith.addf %388, %389 : vector<8x256xf32>
    %391 = arith.mulf %363, %74 : vector<8x256xf32>
    %392 = arith.addf %390, %391 : vector<8x256xf32>
    %393 = arith.addf %387, %392 : vector<8x256xf32>
    %394 = arith.mulf %369, %77 : vector<8x256xf32>
    %395 = arith.mulf %375, %80 : vector<8x256xf32>
    %396 = arith.addf %394, %395 : vector<8x256xf32>
    %397 = arith.mulf %381, %83 : vector<8x256xf32>
    %398 = arith.addf %396, %397 : vector<8x256xf32>
    %399 = arith.addf %393, %398 : vector<8x256xf32>
    %c0_117 = arith.constant 0 : index
    %c0_118 = arith.constant 0 : index
    %c2_119 = arith.constant 2 : index
    %c0_120 = arith.constant 0 : index
    %c0_121 = arith.constant 0 : index
    %400 = vector.load %arg8[%c0_117, %c0_118, %c2_119, %c0_120, %c0_121] : memref<1x1x4x8x256xf32, #tpu.memory_space<vmem>>, vector<1x1x1x8x256xf32>
    %401 = vector.shape_cast %400 : vector<1x1x1x8x256xf32> to vector<8x256xf32>
    %402 = vector.shape_cast %399 : vector<8x256xf32> to vector<1x1x1x8x256xf32>
    tpu.vector_store %arg8[%c0_117, %c0_118, %c2_119, %c0_120, %c0_121], %402 {strides = array<i32>} : memref<1x1x4x8x256xf32, #tpu.memory_space<vmem>>, vector<1x1x1x8x256xf32>,
    %403 = arith.mulf %283, %5 : vector<8x256xf32>
    %404 = arith.mulf %289, %8 : vector<8x256xf32>
    %405 = arith.addf %403, %404 : vector<8x256xf32>
    %406 = arith.mulf %295, %11 : vector<8x256xf32>
    %407 = arith.addf %405, %406 : vector<8x256xf32>
    %408 = arith.addf %87, %407 : vector<8x256xf32>
    %409 = arith.mulf %277, %14 : vector<8x256xf32>
    %410 = arith.mulf %274, %17 : vector<8x256xf32>
    %411 = arith.addf %409, %410 : vector<8x256xf32>
    %412 = arith.mulf %280, %20 : vector<8x256xf32>
    %413 = arith.addf %411, %412 : vector<8x256xf32>
    %414 = arith.addf %408, %413 : vector<8x256xf32>
    %415 = arith.mulf %286, %23 : vector<8x256xf32>
    %416 = arith.mulf %292, %26 : vector<8x256xf32>
    %417 = arith.addf %415, %416 : vector<8x256xf32>
    %418 = arith.mulf %298, %29 : vector<8x256xf32>
    %419 = arith.addf %417, %418 : vector<8x256xf32>
    %420 = arith.addf %414, %419 : vector<8x256xf32>
    %421 = arith.mulf %366, %32 : vector<8x256xf32>
    %422 = arith.mulf %372, %35 : vector<8x256xf32>
    %423 = arith.addf %421, %422 : vector<8x256xf32>
    %424 = arith.mulf %378, %38 : vector<8x256xf32>
    %425 = arith.addf %423, %424 : vector<8x256xf32>
    %426 = arith.addf %420, %425 : vector<8x256xf32>
    %427 = arith.mulf %360, %41 : vector<8x256xf32>
    %428 = arith.mulf %357, %44 : vector<8x256xf32>
    %429 = arith.addf %427, %428 : vector<8x256xf32>
    %430 = arith.mulf %363, %47 : vector<8x256xf32>
    %431 = arith.addf %429, %430 : vector<8x256xf32>
    %432 = arith.addf %426, %431 : vector<8x256xf32>
    %433 = arith.mulf %369, %50 : vector<8x256xf32>
    %434 = arith.mulf %375, %53 : vector<8x256xf32>
    %435 = arith.addf %433, %434 : vector<8x256xf32>
    %436 = arith.mulf %381, %56 : vector<8x256xf32>
    %437 = arith.addf %435, %436 : vector<8x256xf32>
    %438 = arith.addf %432, %437 : vector<8x256xf32>
    %c0_122 = arith.constant 0 : index
    %c0_123 = arith.constant 0 : index
    %c0_124 = arith.constant 0 : index
    %c0_125 = arith.constant 0 : index
    %c0_126 = arith.constant 0 : index
    %439 = vector.load %arg7[%c0_122, %c0_123, %c0_124, %c0_125, %c0_126] : memref<1x1x1x8x256xf32, #tpu.memory_space<vmem>>, vector<1x1x1x8x256xf32>
    %440 = vector.shape_cast %439 : vector<1x1x1x8x256xf32> to vector<8x256xf32>
    %c4_i32_127 = arith.constant 4 : i32
    %441 = arith.addi %0, %c4_i32_127 : i32
    %c4_i32_128 = arith.constant 4 : i32
    %442 = arith.cmpi slt, %441, %c4_i32_128 : i32
    %cst_129 = arith.constant 0.000000e+00 : f32
    %443 = vector.broadcast %cst_129 : f32 to vector<8x256xf32>
    %444 = arith.select %442, %440, %443 : vector<8x256xf32>
    %c32_i32_130 = arith.constant 32 : i32
    %445 = tpu.dynamic_rotate %444 by %c32_i32_130 dim 1 : vector<8x256xf32>, i32 -> vector<8x256xf32>
    %cst_131 = arith.constant 0.000000e+00 : f32
    %446 = vector.broadcast %cst_131 : f32 to vector<8x256xf32>
    %447 = arith.select %91, %445, %446 : vector<8x256xi1>, vector<8x256xf32>
    %c224_i32_132 = arith.constant 224 : i32
    %448 = tpu.dynamic_rotate %444 by %c224_i32_132 dim 1 : vector<8x256xf32>, i32 -> vector<8x256xf32>
    %cst_133 = arith.constant 0.000000e+00 : f32
    %449 = vector.broadcast %cst_133 : f32 to vector<8x256xf32>
    %450 = arith.select %93, %448, %449 : vector<8x256xi1>, vector<8x256xf32>
    %c1_i32_134 = arith.constant 1 : i32
    %451 = tpu.dynamic_rotate %447 by %c1_i32_134 dim 0 : vector<8x256xf32>, i32 -> vector<8x256xf32>
    %cst_135 = arith.constant 0.000000e+00 : f32
    %452 = vector.broadcast %cst_135 : f32 to vector<8x256xf32>
    %453 = arith.select %95, %451, %452 : vector<8x256xi1>, vector<8x256xf32>
    %c7_i32_136 = arith.constant 7 : i32
    %454 = tpu.dynamic_rotate %447 by %c7_i32_136 dim 0 : vector<8x256xf32>, i32 -> vector<8x256xf32>
    %cst_137 = arith.constant 0.000000e+00 : f32
    %455 = vector.broadcast %cst_137 : f32 to vector<8x256xf32>
    %456 = arith.select %97, %454, %455 : vector<8x256xi1>, vector<8x256xf32>
    %c1_i32_138 = arith.constant 1 : i32
    %457 = tpu.dynamic_rotate %444 by %c1_i32_138 dim 0 : vector<8x256xf32>, i32 -> vector<8x256xf32>
    %cst_139 = arith.constant 0.000000e+00 : f32
    %458 = vector.broadcast %cst_139 : f32 to vector<8x256xf32>
    %459 = arith.select %95, %457, %458 : vector<8x256xi1>, vector<8x256xf32>
    %c7_i32_140 = arith.constant 7 : i32
    %460 = tpu.dynamic_rotate %444 by %c7_i32_140 dim 0 : vector<8x256xf32>, i32 -> vector<8x256xf32>
    %cst_141 = arith.constant 0.000000e+00 : f32
    %461 = vector.broadcast %cst_141 : f32 to vector<8x256xf32>
    %462 = arith.select %97, %460, %461 : vector<8x256xi1>, vector<8x256xf32>
    %c1_i32_142 = arith.constant 1 : i32
    %463 = tpu.dynamic_rotate %450 by %c1_i32_142 dim 0 : vector<8x256xf32>, i32 -> vector<8x256xf32>
    %cst_143 = arith.constant 0.000000e+00 : f32
    %464 = vector.broadcast %cst_143 : f32 to vector<8x256xf32>
    %465 = arith.select %95, %463, %464 : vector<8x256xi1>, vector<8x256xf32>
    %c7_i32_144 = arith.constant 7 : i32
    %466 = tpu.dynamic_rotate %450 by %c7_i32_144 dim 0 : vector<8x256xf32>, i32 -> vector<8x256xf32>
    %cst_145 = arith.constant 0.000000e+00 : f32
    %467 = vector.broadcast %cst_145 : f32 to vector<8x256xf32>
    %468 = arith.select %97, %466, %467 : vector<8x256xi1>, vector<8x256xf32>
    %469 = arith.mulf %453, %59 : vector<8x256xf32>
    %470 = arith.mulf %459, %62 : vector<8x256xf32>
    %471 = arith.addf %469, %470 : vector<8x256xf32>
    %472 = arith.mulf %465, %65 : vector<8x256xf32>
    %473 = arith.addf %471, %472 : vector<8x256xf32>
    %474 = arith.addf %438, %473 : vector<8x256xf32>
    %475 = arith.mulf %447, %68 : vector<8x256xf32>
    %476 = arith.mulf %444, %71 : vector<8x256xf32>
    %477 = arith.addf %475, %476 : vector<8x256xf32>
    %478 = arith.mulf %450, %74 : vector<8x256xf32>
    %479 = arith.addf %477, %478 : vector<8x256xf32>
    %480 = arith.addf %474, %479 : vector<8x256xf32>
    %481 = arith.mulf %456, %77 : vector<8x256xf32>
    %482 = arith.mulf %462, %80 : vector<8x256xf32>
    %483 = arith.addf %481, %482 : vector<8x256xf32>
    %484 = arith.mulf %468, %83 : vector<8x256xf32>
    %485 = arith.addf %483, %484 : vector<8x256xf32>
    %486 = arith.addf %480, %485 : vector<8x256xf32>
    %c0_146 = arith.constant 0 : index
    %c0_147 = arith.constant 0 : index
    %c3_148 = arith.constant 3 : index
    %c0_149 = arith.constant 0 : index
    %c0_150 = arith.constant 0 : index
    %487 = vector.load %arg8[%c0_146, %c0_147, %c3_148, %c0_149, %c0_150] : memref<1x1x4x8x256xf32, #tpu.memory_space<vmem>>, vector<1x1x1x8x256xf32>
    %488 = vector.shape_cast %487 : vector<1x1x1x8x256xf32> to vector<8x256xf32>
    %489 = vector.shape_cast %486 : vector<8x256xf32> to vector<1x1x1x8x256xf32>
    tpu.vector_store %arg8[%c0_146, %c0_147, %c3_148, %c0_149, %c0_150], %489 {strides = array<i32>} : memref<1x1x4x8x256xf32, #tpu.memory_space<vmem>>, vector<1x1x1x8x256xf32>,
    return
  }
  func.func @transform_0(%arg0: i32, %arg1: i32, %arg2: i32) -> (i32, i32, i32) {
    %c0_i32 = arith.constant 0 : i32
    %c0_i32_0 = arith.constant 0 : i32
    %c0_i32_1 = arith.constant 0 : i32
    return %arg1, %c0_i32, %c0_i32_0 : i32, i32, i32
  }
  func.func @transform_1(%arg0: i32, %arg1: i32, %arg2: i32) -> (i32, i32, i32) {
    %c0_i32 = arith.constant 0 : i32
    %c0_i32_0 = arith.constant 0 : i32
    %c0_i32_1 = arith.constant 0 : i32
    return %arg1, %c0_i32, %c0_i32_0 : i32, i32, i32
  }
  func.func @transform_2(%arg0: i32, %arg1: i32, %arg2: i32) -> (i32, i32, i32, i32, i32) {
    %c4_i32 = arith.constant 4 : i32
    %0 = arith.muli %arg2, %c4_i32 : i32
    %c1_i32 = arith.constant 1 : i32
    %1 = arith.subi %0, %c1_i32 : i32
    %c0_i32 = arith.constant 0 : i32
    %2 = arith.maxsi %1, %c0_i32 : i32
    %c0_i32_0 = arith.constant 0 : i32
    %c0_i32_1 = arith.constant 0 : i32
    %c0_i32_2 = arith.constant 0 : i32
    return %arg0, %arg1, %2, %c0_i32_0, %c0_i32_1 : i32, i32, i32, i32, i32
  }
  func.func @transform_3(%arg0: i32, %arg1: i32, %arg2: i32) -> (i32, i32, i32, i32, i32) {
    %c0_i32 = arith.constant 0 : i32
    %c0_i32_0 = arith.constant 0 : i32
    %c0_i32_1 = arith.constant 0 : i32
    return %arg0, %arg1, %arg2, %c0_i32, %c0_i32_0 : i32, i32, i32, i32, i32
  }
  func.func @transform_4(%arg0: i32, %arg1: i32, %arg2: i32) -> (i32, i32, i32, i32, i32) {
    %c4_i32 = arith.constant 4 : i32
    %0 = arith.muli %arg2, %c4_i32 : i32
    %c4_i32_0 = arith.constant 4 : i32
    %1 = arith.addi %0, %c4_i32_0 : i32
    %c3_i32 = arith.constant 3 : i32
    %2 = arith.minsi %1, %c3_i32 : i32
    %c0_i32 = arith.constant 0 : i32
    %c0_i32_1 = arith.constant 0 : i32
    %c0_i32_2 = arith.constant 0 : i32
    return %arg0, %arg1, %2, %c0_i32, %c0_i32_1 : i32, i32, i32, i32, i32
  }
  func.func @transform_5(%arg0: i32, %arg1: i32, %arg2: i32) -> (i32, i32, i32, i32, i32) {
    %c0_i32 = arith.constant 0 : i32
    %c0_i32_0 = arith.constant 0 : i32
    %c0_i32_1 = arith.constant 0 : i32
    return %arg0, %arg1, %arg2, %c0_i32, %c0_i32_0 : i32, i32, i32, i32, i32
  }
}

</mosaic_0001>

<bundles_post_ra>
// kernel: tpu_custom_call.1
= control target key start
LH: loop header
LB: loop body
LE: loop exit
PB: predicated region body
PF: predicated region fallthrough
CT: control target
= control target key end

     0   :  { %s3031_s0 = inlined_call_operand.vmem [shape: f32[1,27,256], index: 0, kind: input, shape index: {}]   ;;  %s3032_s1 = inlined_call_operand.vmem [shape: f32[1,1,256], index: 1, kind: input, shape index: {}]   ;;  %s3033_s2 = inlined_call_operand.hbm [shape: f32[2,1,4,8,256], index: 2, kind: input, shape index: {}]   ;;  %s3034_s3 = inlined_call_operand.hbm [shape: f32[2,1,4,8,256], index: 3, kind: input, shape index: {}]   ;;  %s3035_s4 = inlined_call_operand.hbm [shape: f32[2,1,4,8,256], index: 4, kind: input, shape index: {}]   ;;  %s3036_s5 = inlined_call_operand.hbm [shape: f32[2,1,4,8,256], index: 5, kind: output, shape index: {}]  }
   0x1   :  { %3120 = sst [smem:[#allocation92_spill]] %s3034_s3 }
   0x2   :  { %10 = vsyncpa [#allocation3], 0 }
   0x3   :  { %12 = vsyncpa [#allocation3 + $0x1], 0 }
   0x4   :  { %13 = vsyncpa [#allocation6], 0 }
   0x5   :  { %15 = vsyncpa [#allocation6 + $0x1], 0 }
   0x6   :  { %16 = vsyncpa [#allocation4], 0 }
   0x7   :  { %18 = vsyncpa [#allocation4 + $0x1], 0  ;;  %s1792_s18 = smov 0   ;;  %s1794_s19 = smov 0  }
   0x8   :  { %s1796_s20 = smov 0   ;;  %s1798_s21 = smov 0  }
   0x9   :  { %s1800_s22 = smov 0   ;;  %s1802_s23 = smov 0  }
   0xa LB: > { %3121 = sst [smem:[#allocation12_spill]] %s1741_s20  ;;  %s1823_s24 = sadd.s32 4294967295, %s1753_s23   ;;  %s1753_s23 = sphi %s1802_s23, %s24_s23   ;;  %s1749_s22 = sphi %s1800_s22, %s3365_s22   ;;  %s1745_s21 = sphi %s1798_s21, %s3364_s21   ;;  %s1741_s20 = sphi %s1796_s20, %s3363_s20   ;;  %s1737_s19 = sphi %s1794_s19, %s3367_s19   ;;  %s1733_s18 = sphi %s1792_s18, %s3366_s18  }
   0xb   : > { %3122 = sst [smem:[#allocation13_spill]] %s1749_s22  ;;  %s1434_s25 = sadd.s32 4294967294, %s1753_s23  }
   0xc   : > { %3123 = sst [smem:[#allocation14_spill]] %s1753_s23  ;;  %s43_s26 = sadd.s32 1, %s1749_s22 }
   0xd   : > { %s114_s27 = sadd.s32 1, %s1741_s20  ;;  %p45_p0 = scmp.ge.s32.totalorder %s43_s26, 2 }
   0xe   : > { %p121_p1 = scmp.ne.s32.totalorder %s1741_s20, %s1737_s19  ;;  %p122_p2 = scmp.eq.s32.totalorder %s1753_s23, 0 }
   0xf   : > { %p127_p3 = scmp.ne.s32.totalorder %s1737_s19, %s1733_s18  ;;  %s3369_s26 = smov (%p45_p0, %s43_s26), 0 }
  0x10   : > { %3124 = sst [smem:[#allocation15_spill]] %s3369_s26  ;;  %p1835_p4 = por %p122_p2, %p121_p1 }
  0x11   : > { %p128_p5 = scmp.eq.s32.totalorder %s1823_s24, 0  ;;  %s107_s29 = ssub.s32 %s1749_s22, %s3369_s26 }
  0x12   : > { %p223_p6 = scmp.eq.s32.totalorder %s1823_s24, 1  ;;  %p112_p7 = scmp.eq.s32.totalorder %s107_s29, 0 }
  0x13   : > { %p1843_p8 = por %p128_p5, %p127_p3  ;;  %p229_p10 = scmp.eq.s32.totalorder %s1434_s25, 1 }
  0x14   : > { %p1847_p9 = por %p223_p6, %p121_p1  ;;  %p1438_p12 = scmp.ge.s32.totalorder %s1753_s23, 2 }
  0x15   : > { %s1852_s7 = scalar_select %p112_p7, %s1741_s20, %s114_s27  }
  0x16   : > { %p1854_p11 = por %p229_p10, %p127_p3  ;;  %p1498_p13 = scmp.lt.s32.totalorder %s1753_s23, 2 }
  0x17   : > { %3128 = sst [smem:[#allocation16_spill]] %s1852_s7  ;;  %s264_s9 = sand.u32 1, %s1741_s20  }
  0x18   : > { %s3129_s8 = scalar_select %p1854_p11, 1, 0 }
  0x19   : > { %s1862_s10 = sshll.u32 %s1749_s22, 6  ;;  %s292_s11 = sand.u32 1, %s1753_s23  }
  0x1a   : > { %3130 = sst [smem:[#allocation17_spill]] %s3129_s8  ;;  %p1867_p0 = pnand %p1498_p13, %p1835_p4 }
  0x1b   : > { %s1442_s13 = sshll.u32 %s264_s9, 6  ;;  %s3132_s3 = sld [smem:[#allocation92_spill]] }
  0x1c   : > { %s296_s25 = scalar_lea.vmem [#allocation5], %s1442_s13  ;;  %s293_s29 = scalar_lea.sflag [#allocation6], %s292_s11 }
  0x1d   : > { %s309_s27 = sshll.u32 %s296_s25, 4  ;;  %s1755_s28 = smov 256   ;;  %s310_s27 = int_to_ptr.vmem [resolvable:$true] %s309_s27 }
  0x1e   : > { %s1756_s26 = smov 16   ;;  %p1448_p1 = scmp.ge.s32.totalorder %s1753_s23, 1 }
  0x1f   : > { %p345_p2 = scmp.lt.s32.totalorder %s1753_s23, 3  ;;  %s1439_s14 = sshll.u32 %s264_s9, 4 }
  0x20   : > { %s281_s13 = scalar_lea.hbm %s3033_s2, %s1862_s10  ;;  %s268_s11 = scalar_lea.vmem [#allocation2], %s1439_s14 }
  0x21   : > { %s306_s16 = scalar_lea.hbm %s3132_s3, %s1862_s10  ;;  %p1879_p3 = pnand %p1448_p1, %p345_p2 }
  0x22   : > { %s307_s17 = sshll.u32 %s306_s16, 4  ;;  %s283_s25 = sshll.u32 %s281_s13, 4  ;;  %s308_s17 = int_to_ptr.hbm [resolvable:$true] %s307_s17  ;;  %s284_s25 = int_to_ptr.hbm [resolvable:$true] %s283_s25 }
  0x23   : > { %1490 = dma.hbm_to_vmem [thread:$0]  (!%p1867_p0), %s308_s17, 1024, %s310_s27, %s293_s29, %s1755_s28, %s1755_s28, %s1756_s26  }
  0x24   : > { %s285_s3 = sshll.u32 %s268_s11, 4  ;;  %s265_s7 = scalar_lea.sflag [#allocation3], %s264_s9  ;;  %s286_s3 = int_to_ptr.vmem [resolvable:$true] %s285_s3 }
  0x25   : > { %1487 = dma.hbm_to_vmem [thread:$0]  (!%p1867_p0), %s284_s25, 256, %s286_s3, %s265_s7  }
  0x26   : > { %s1473_s26 = sadd.s32 48, %s1862_s10  ;;  %s323_s17 = scalar_lea.vmem [#allocation7], %s1439_s14 }
  0x27   : > { %s340_s27 = sshll.u32 %s323_s17, 4  ;;  %s336_s23 = scalar_lea.hbm %s3035_s4, %s1473_s26  ;;  %s341_s27 = int_to_ptr.vmem [resolvable:$true] %s340_s27 }
  0x28   : > { %s338_s8 = sshll.u32 %s336_s23, 4  ;;  %349 = sbr.rel (%p1879_p3) target bundleno = 321 (0x141), region = 40  ;;  %s339_s8 = int_to_ptr.hbm [resolvable:$true] %s338_s8 }
  0x29   : > { %1493 = dma.hbm_to_vmem [thread:$0]  (!%p1867_p0), %s339_s8, 256, %s341_s27, %s293_s29  }
  0x2d   : > { %s1898_s9 = sand.u32 1, %s1737_s19  }
  0x2e   : > { %s352_s3 = scalar_lea.sflag [#allocation3], %s1898_s9 }
  0x2f   : > { %1720 = dma.done.wait (%p1843_p8), %s352_s3, 256  }
  0x30   : > { %1722 = vsyncadd (%p1843_p8), %s352_s3, 4294967040  ;;  %s361_s20 = sand.u32 1, %s1823_s24   ;;  %s1450_s23 = sshll.u32 %s1898_s9, 6 }
  0x31   : > { %s362_s7 = scalar_lea.sflag [#allocation6], %s361_s20  ;;  %s1909_s22 = scalar_lea.vmem [#allocation5], %s1450_s23 }
  0x32   : > { %1724 = dma.done.wait (%p1843_p8), %s362_s7, 1280  }
  0x33   : > { %1726 = vsyncadd (%p1843_p8), %s362_s7, 4294966016  ;;  %v1757_v0 = vmov 0.0   ;;  %s1758_s8 = smov 32   ;;  %v1916_v1 = vld [vmem:[%s1909_s22 + $0x8] sm:$0xff]  ;;  %v1920_v2 = vld [vmem:[%s1909_s22] sm:$0xff]  ;;  %s1759_s24 = smov 96   ;;  %v510_v9 = vlaneseq }
  0x34   : > { %1556 = vrot.lane.b32.xlu0 %v1757_v0, %s1758_s8  ;;  %612 = vrot.lane.b32.xlu1 %v1916_v1, %s1758_s8  ;;  %v1923_v3 = vld [vmem:[%s1909_s22 + $0x18] sm:$0xff]  ;;  %v1928_v4 = vld [vmem:[%s1909_s22 + $0x10] sm:$0xff]  ;;  %v556_v11 = vrot.slane %v1757_v0, 7  ;;  %v560_v14 = vrot.slane %v1757_v0, 1  ;;  %v635_v22 = vrot.slane %v1916_v1, 7  ;;  %v639_v36 = vrot.slane %v1916_v1, 1 }
  0x35   : > { %691 = vrot.lane.b32.xlu2 %v1923_v3, %s1758_s8  ;;  %v1932_v5 = vld [vmem:[%s1909_s22 + $0x28] sm:$0xff]  ;;  %v1935_v6 = vld [vmem:[%s1909_s22 + $0x20] sm:$0xff]  ;;  %v1460_v7 = vld [vmem:[%s1909_s22 + $0x38] sm:$0xff]  ;;  %v1947_v10 = vshrl.u32 %v510_v9, 7  ;;  %v2007_v30 = vand.u32 127, %v510_v9  ;;  %v634_v45 = vrot.slane %v1920_v2, 7 }
  0x36   : > { %3134 = vst [vmem:[#allocation18_spill] sm:$0xff] %v1935_v6  ;;  %v1459_v8 = vld [vmem:[%s1909_s22 + $0x30] sm:$0xff]  ;;  %v1952_v12 = vld [vmem:[%s3031_s0] sm:$0xff]  ;;  %v1957_v13 = vld [vmem:[%s3031_s0 + $0x8] sm:$0xff]  ;;  %v638_v46 = vrot.slane %v1920_v2, 1  ;;  %s1236_s29 = scalar_lea.sflag [#allocation4], %s1898_s9 }
  0x37   : > { %3135 = vst [vmem:[#allocation19_spill] sm:$0xff] %v1952_v12  ;;  %vm519_vm0 = vcmp.ge.s32.totalorder %v1947_v10, 1  ;;  %v1961_v15 = vperm.slane %v1952_v12, 0  ;;  %v1964_v16 = vperm.slane %v1952_v12, 1  ;;  %v1967_v17 = vperm.slane %v1957_v13, 1  ;;  %v1999_v27 = vld [vmem:[%s3031_s0 + $0x10] sm:$0xff] }
  0x38   : > { %3136 = vst [vmem:[#allocation20_spill] sm:$0xff] %v1957_v13  ;;  %v1970_v18 = vperm.slane %v1952_v12, 4  ;;  %vm520_vm1 = vcmp.lt.s32.totalorder %v1947_v10, 7  ;;  %v1974_v19 = vperm.slane %v1957_v13, 0  ;;  %v1977_v20 = vperm.slane %v1957_v13, 4  ;;  %v2016_v32 = vld [vmem:[%s3031_s0 + $0x18] sm:$0xff] }
  0x39   : > { %3137 = vst [vmem:[#allocation21_spill] sm:$0xff] %v1964_v16  ;;  %v1981_v21 = vsel %vm519_vm0, %v556_v11, 0.0  ;;  %v1985_v23 = vperm.slane %v1952_v12, 3  ;;  %v1988_v24 = vperm.slane %v1957_v13, 3  ;;  %v1991_v25 = vperm.slane %v1952_v12, 6  ;;  %v2038_v39 = vld [vmem:[%s3031_s0 + $0x28] sm:$0xff] }
  0x3a   : > { %3138 = vst [vmem:[#allocation22_spill] sm:$0xff] %v1967_v17  ;;  %v1994_v26 = vperm.slane %v1957_v13, 6  ;;  %v2002_v28 = vperm.slane %v1952_v12, 7  ;;  %v2005_v29 = vperm.slane %v1957_v13, 7  ;;  %v2011_v31 = vsel %vm520_vm1, %v560_v14, 0.0  ;;  %v2049_v42 = vld [vmem:[%s3031_s0 + $0x20] sm:$0xff] }
  0x3b   : > { %3139 = vst [vmem:[#allocation23_spill] sm:$0xff] %v1970_v18  ;;  %v2020_v33 = vmul.f32 %v1981_v21, %v1964_v16  ;;  %v2024_v34 = vmul.f32 %v1981_v21, %v1967_v17  ;;  %v2027_v35 = vmul.f32 0.0, %v1970_v18  ;;  %v2031_v37 = vmul.f32 0.0, %v1977_v20  ;;  %s1687_s25 = scalar_lea.hbm %s3036_s5, 128 }
  0x3c   : > { %610 = vrot.lane.b32.xlu0 %v1920_v2, %s1758_s8  ;;  %689 = vrot.lane.b32.xlu1 %v1928_v4, %s1758_s8  ;;  %3140 = vst [vmem:[#allocation24_spill] sm:$0xff] %v1977_v20  ;;  %v637_v38 = vsel %vm519_vm0, %v635_v22, 0.0  ;;  %v2041_v40 = vperm.slane %v2016_v32, 2  ;;  %v2044_v41 = vperm.slane %v1999_v27, 4  ;;  %v2052_v43 = vperm.slane %v1999_v27, 5 }
  0x3d   : > { %842 = vrot.lane.b32.xlu2 %v1935_v6, %s1758_s8  ;;  %3141 = vst [vmem:[#allocation25_spill] sm:$0xff] %v1981_v21  ;;  %v2055_v44 = vperm.slane %v2016_v32, 5  ;;  %v2061_v47 = vmul.f32 %v2011_v31, %v2002_v28  ;;  %v2065_v48 = vmul.f32 %v2011_v31, %v2005_v29  ;;  %v2068_v49 = vperm.slane %v1999_v27, 1 }
  0x3e   : > { %3142 = vst [vmem:[#allocation26_spill] sm:$0xff] %v1999_v27  ;;  %v2071_v50 = vperm.slane %v2016_v32, 1  ;;  %v641_v51 = vsel %vm520_vm1, %v639_v36, 0.0  ;;  %v2076_v52 = vperm.slane %v1999_v27, 2  ;;  %v2079_v53 = vperm.slane %v2016_v32, 4 }
  0x3f   : > { %3143 = vst [vmem:[#allocation27_spill] sm:$0xff] %v2002_v28  ;;  %v2082_v54 = vperm.slane %v2038_v39, 0  ;;  %v2085_v55 = vperm.slane %v1999_v27, 7  ;;  %v2088_v56 = vperm.slane %v2016_v32, 7  ;;  %v2091_v57 = vperm.slane %v2049_v42, 0 }
  0x40   : > { %3144 = vst [vmem:[#allocation28_spill] sm:$0xff] %v2005_v29  ;;  %v2094_v58 = vmul.f32 %v637_v38, %v2041_v40  ;;  %v636_v59 = vsel %vm519_vm0, %v634_v45, 0.0  ;;  %v640_v60 = vsel %vm520_vm1, %v638_v46, 0.0  ;;  %v2102_v61 = vmul.f32 %v1920_v2, %v2052_v43  ;;  %v2134_v36 = vld [vmem:[%s3031_s0 + $0x38] sm:$0x7] }
  0x41   : > { %3145 = vst [vmem:[#allocation29_spill] sm:$0xff] %v2011_v31  ;;  %v2106_v62 = vmul.f32 %v1916_v1, %v2055_v44  ;;  %v2109_v63 = vmul.f32 %v637_v38, %v1967_v17  ;;  %v2118_v9 = vmul.f32 %v641_v51, %v2082_v54  ;;  %v2122_v11 = vmul.f32 %v1916_v1, %v1977_v20 }
  0x42   : > { %3146 = vst [vmem:[#allocation30_spill] sm:$0xff] %v2016_v32  ;;  %v717_v14 = vrot.slane %v1928_v4, 1  ;;  %v718_v22 = vrot.slane %v1923_v3, 1  ;;  %v2137_v38 = vmul.f32 %v636_v59, %v2076_v52  ;;  %v2143_v45 = vmul.f32 %v636_v59, %v1964_v16 }
  0x43   : > { %3147 = vst [vmem:[#allocation31_spill] sm:$0xff] %v2038_v39  ;;  %v2146_v46 = vmul.f32 %v640_v60, %v2002_v28  ;;  %v2149_v31 = vperm.slane %v2049_v42, 3  ;;  %v2152_v21 = vperm.slane %v2038_v39, 3  ;;  %v2155_v32 = vperm.slane %v2049_v42, 6 }
  0x44   : > { %844 = vrot.lane.b32.xlu0 %v1932_v5, %s1758_s8  ;;  %1561 = vrot.lane.b32.xlu1 %v1757_v0, %s1759_s24  ;;  %3148 = vst [vmem:[#allocation32_spill] sm:$0xff] %v2041_v40  ;;  %v2158_v27 = vperm.slane %v2038_v39, 6  ;;  %vm534_vm2 = vcmp.lt.s32.totalorder %v2007_v30, 32  ;;  %v2169_v12 = vperm.slane %v2134_v36, 1  ;;  %vm515_vm3 = vcmp.ge.s32.totalorder %v2007_v30, 32 }
  0x45   : > { %618 = vrot.lane.b32.xlu2 %v1920_v2, %s1759_s24  ;;  %3149 = vst [vmem:[#allocation33_spill] sm:$0xff] %v2044_v41  ;;  %vm543_vm4 = vcmp.lt.s32.totalorder %v2007_v30, 96 }
  0x46   : > { %3150 = vst [vmem:[#allocation34_spill] sm:$0xff] %v2049_v42 }
  0x47   : > { %3151 = vst [vmem:[#allocation35_spill] sm:$0xff] %v2052_v43 }
  0x48   : > { %3152 = vst [vmem:[#allocation36_spill] sm:$0xff] %v2055_v44 }
  0x49   : > { %3153 = vst [vmem:[#allocation37_spill] sm:$0xff] %v2068_v49 }
  0x4a   : > { %3154 = vst [vmem:[#allocation38_spill] sm:$0xff] %v2071_v50 }
  0x4b   : > { %3155 = vst [vmem:[#allocation39_spill] sm:$0xff] %v2076_v52 }
  0x4c   : > { %620 = vrot.lane.b32.xlu0 %v1916_v1, %s1759_s24  ;;  %697 = vrot.lane.b32.xlu1 %v1928_v4, %s1759_s24  ;;  %3156 = vst [vmem:[#allocation40_spill] sm:$0xff] %v2079_v53  ;;  %v2140_v1 = vmul.f32 %v640_v60, %v2091_v57 }
  0x4d   : > { %699 = vrot.lane.b32.xlu2 %v1923_v3, %s1759_s24  ;;  %3157 = vst [vmem:[#allocation41_spill] sm:$0xff] %v2082_v54 }
  0x4e   : > { %3158 = vst [vmem:[#allocation42_spill] sm:$0xff] %v2085_v55 }
  0x4f   : > { %3159 = vst [vmem:[#allocation43_spill] sm:$0xff] %v2088_v56 }
  0x50   : > { %3160 = vst [vmem:[#allocation44_spill] sm:$0xff] %v2091_v57 }
  0x51   : > { %3161 = vst [vmem:[#allocation45_spill] sm:$0xff] %v2109_v63  ;;  %v719_v63 = vsel %vm520_vm1, %v717_v14, 0.0  ;;  %v2195_v14 = vperm.slane %v2134_v36, 0 }
  0x52   : > { %3162 = vst [vmem:[#allocation46_spill] sm:$0xff] %v2118_v9  ;;  %v2186_v9 = vperm.slane %v2038_v39, 2 }
  0x53   : > { %3164 = vst [vmem:[#allocation48_spill] sm:$0xff] %v2134_v36 }
  0x54   : > { %850 = vrot.lane.b32.xlu0 %v1935_v6, %s1759_s24  ;;  %852 = vrot.lane.b32.xlu1 %v1932_v5, %s1759_s24  ;;  %3165 = vst [vmem:[#allocation49_spill] sm:$0xff] %v2140_v1  ;;  %v2189_v1 = vperm.slane %v2049_v42, 5 }
  0x55   : > { %996 = vrot.lane.b32.xlu2 %v1459_v8, %s1758_s8  ;;  %3166 = vst [vmem:[#allocation50_spill] sm:$0xff] %v2143_v45  ;;  %v2180_v45 = vperm.slane %v2038_v39, 5  ;;  %v2209_v39 = vmul.f32 %v1923_v3, %v2158_v27 }
  0x56   : > { %3167 = vst [vmem:[#allocation51_spill] sm:$0xff] %v2146_v46  ;;  %v2173_v46 = vmul.f32 %v641_v51, %v2005_v29 }
  0x57   : > { %3168 = vst [vmem:[#allocation52_spill] sm:$0xff] %v2149_v31 }
  0x58   : > { %3169 = vst [vmem:[#allocation53_spill] sm:$0xff] %v2152_v21 }
  0x59   : > { %3170 = vst [vmem:[#allocation54_spill] sm:$0xff] %v2155_v32 }
  0x5a   : > { %3171 = vst [vmem:[#allocation55_spill] sm:$0xff] %v2158_v27 }
  0x5b   : > { %3173 = vst [vmem:[#allocation57_spill] sm:$0xff] %v2169_v12 }
  0x5c   : > { %998 = vrot.lane.b32.xlu0 %v1460_v7, %s1758_s8  ;;  %1004 = vrot.lane.b32.xlu1 %v1459_v8, %s1759_s24  ;;  %v714_v8 = vrot.slane %v1923_v3, 7  ;;  %3174 = vst [vmem:[#allocation58_spill] sm:$0xff] %v2173_v46 }
  0x5d   : > { %1006 = vrot.lane.b32.xlu2 %v1460_v7, %s1759_s24  ;;  %v713_v7 = vrot.slane %v1928_v4, 7  ;;  %3175 = vst [vmem:[#allocation59_spill] sm:$0xff] %v2180_v45 }
  0x5e   : > { %v716_v60 = vsel %vm519_vm0, %v714_v8, 0.0  ;;  %v2183_v8 = vperm.slane %v2049_v42, 2  ;;  %3177 = vst [vmem:[#allocation61_spill] sm:$0xff] %v2186_v9 }
  0x5f   : > { %v715_v59 = vsel %vm519_vm0, %v713_v7, 0.0  ;;  %v720_v7 = vsel %vm520_vm1, %v718_v22, 0.0  ;;  %3178 = vst [vmem:[#allocation62_spill] sm:$0xff] %v2189_v1  ;;  %v2201_v46 = vmul.f32 %v716_v60, %v2152_v21 }
  0x60   : > { %3176 = vst [vmem:[#allocation60_spill] sm:$0xff] %v2183_v8  ;;  %v2198_v22 = vmul.f32 %v715_v59, %v2149_v31  ;;  %v2205_v8 = vmul.f32 %v1928_v4, %v2155_v32  ;;  %v2215_v36 = vmul.f32 %v720_v7, %v2169_v12  ;;  %v2218_v42 = vmul.f32 %v715_v59, %v2076_v52 }
  0x61   : > { %3180 = vst [vmem:[#allocation64_spill] sm:$0xff] %v2195_v14 }
  0x62   : > { %3181 = vst [vmem:[#allocation65_spill] sm:$0xff] %v2198_v22  ;;  %v2221_v22 = vmul.f32 %v716_v60, %v2041_v40 }
  0x63   : > { %3182 = vst [vmem:[#allocation66_spill] sm:$0xff] %v2201_v46  ;;  %v2225_v46 = vmul.f32 %v1928_v4, %v2052_v43 }
  0x64   : > { %1566 = vrot.lane.b32.xlu0 %v1757_v0, %s1758_s8  ;;  %1571 = vrot.lane.b32.xlu1 %v1757_v0, %s1759_s24  ;;  %v2113_v0 = vmul.f32 %v1920_v2, %v1970_v18  ;;  %v2129_v2 = vld [vmem:[%s3031_s0 + $0x30] sm:$0x7]  ;;  %3183 = vst [vmem:[#allocation67_spill] sm:$0xff] %v2205_v8  ;;  %v2232_v8 = vmul.f32 %v719_v63, %v2091_v57  ;;  %v870_v57 = vrot.slane %v1935_v6, 1  ;;  %s2776_s24 = scalar_lea.vmem [#allocation8], %s1450_s23  ;;  %s1474_s23 = sshll.u32 %s1745_s21, 6 }
  0x65   : > { %3163 = vst [vmem:[#allocation47_spill] sm:$0xff] %v2129_v2  ;;  %v2166_v13 = vperm.slane %v2129_v2, 1  ;;  %v2192_v51 = vperm.slane %v2129_v2, 0  ;;  %s1252_s30 = scalar_lea.hbm %s3036_s5, %s1474_s23  ;;  %s1253_s10 = sshll.u32 %s2776_s24, 4  ;;  %s1254_s10 = int_to_ptr.vmem [resolvable:$true] %s1253_s10 }
  0x66   : > { %3185 = vst [vmem:[#allocation69_spill] sm:$0xff] %v2215_v36  ;;  %v2238_v36 = vmul.f32 %v715_v59, %v1964_v16  ;;  %v2253_v59 = vmul.f32 %v1928_v4, %v1970_v18  ;;  %s1255_s12 = sshll.u32 %s1252_s30, 4  ;;  %s1256_s12 = int_to_ptr.hbm [resolvable:$true] %s1255_s12 }
  0x67   : > { %3172 = vst [vmem:[#allocation56_spill] sm:$0xff] %v2166_v13  ;;  %v2212_v2 = vmul.f32 %v719_v63, %v2166_v13  ;;  %s1681_s14 = sshra.s32 %s1256_s12, 4  ;;  %s1682_s14 = int_to_ptr.hbm [resolvable:$true] %s1681_s14 }
  0x68   : > { %3179 = vst [vmem:[#allocation63_spill] sm:$0xff] %v2192_v51  ;;  %v2229_v51 = vmul.f32 %v1923_v3, %v2055_v44  ;;  %v867_v44 = vrot.slane %v1932_v5, 7  ;;  %s1683_s15 = scalar_lea.hbm %s1682_s14, 64  ;;  %p1688_p7 = scmp.lt.s32.totalorder %s1682_s14, %s3036_s5 }
  0x69   : > { %3184 = vst [vmem:[#allocation68_spill] sm:$0xff] %v2212_v2  ;;  %v2235_v2 = vmul.f32 %v720_v7, %v2082_v54  ;;  %p1684_p4 = scmp.ne.s32.totalorder %s1682_s14, %s1683_s15  ;;  %p1689_p8 = scmp.lt.s32.totalorder %s1687_s25, %s1683_s15 }
  0x6a   : > { %3186 = vst [vmem:[#allocation70_spill] sm:$0xff] %v2218_v42  ;;  %v2241_v42 = vmul.f32 %v716_v60, %v1967_v17  ;;  %v2256_v60 = vmul.f32 %v719_v63, %v2002_v28  ;;  %v2259_v17 = vmul.f32 %v720_v7, %v2005_v29  ;;  %v2271_v4 = vsel %vm519_vm0, %v867_v44, 0.0 }
  0x6b   : > { %3187 = vst [vmem:[#allocation71_spill] sm:$0xff] %v2221_v22  ;;  %v2245_v22 = vmul.f32 %v1923_v3, %v1977_v20  ;;  %v2263_v3 = vmul.f32 %v1932_v5, %v2158_v27  ;;  %v2275_v63 = vsel %vm520_vm1, %v870_v57, 0.0  ;;  %v2283_v27 = vmul.f32 %v1935_v6, %v2155_v32  ;;  %p1685_p5 = pnand %p1684_p4, %p1847_p9  ;;  %p1690_p10 = por %p1689_p8, %p1688_p7 }
  0x6c   : > { %3188 = vst [vmem:[#allocation72_spill] sm:$0xff] %v2225_v46  ;;  %v866_v46 = vrot.slane %v1935_v6, 7 }
  0x6d   : > { %3189 = vst [vmem:[#allocation73_spill] sm:$0xff] %v2232_v8  ;;  %v871_v8 = vrot.slane %v1932_v5, 1  ;;  %p1686_p6 = pneg %p1685_p5 }
  0x6e   : > { %3190 = vst [vmem:[#allocation74_spill] sm:$0xff] %v2245_v22  ;;  %v2267_v22 = vsel %vm519_vm0, %v866_v46, 0.0 }
  0x6f   : > { %3191 = vst [vmem:[#allocation75_spill] sm:$0xff] %v2275_v63  ;;  %v2279_v7 = vsel %vm520_vm1, %v871_v8, 0.0  ;;  %v2295_v57 = vmul.f32 %v2267_v22, %v2149_v31  ;;  %v2299_v8 = vmul.f32 %v2271_v4, %v2152_v21  ;;  %p1691_p13 = pnand %p1690_p10, %p1686_p6 }
  0xa6   : > { %v1557_v54 = vpop.permute.xlu0 %1556 }
  0xa7   : > { %v1559_v20 = vunpack.i.h.bf16 %v1557_v54  ;;  %v1558_v16 = vunpack.i.l.bf16 %v1557_v54  ;;  %v2287_v54 = vmul.f32 %v1935_v6, %v2052_v43 }
  0xa9   : > { %3192 = vst [vmem:[#allocation76_spill] sm:$0xff] %v2287_v54  ;;  %v535_v44 = vsel %vm534_vm2, %v1558_v16, %v1559_v20  ;;  %v536_v46 = vsel %vm534_vm2, %v1559_v20, %v1558_v16  ;;  %v613_v16 = vpop.permute.xlu1 %612  ;;  %v2307_v20 = vmul.f32 %v2275_v63, %v2166_v13 }
  0xaa   : > { %v537_v32 = vsel %vm515_vm3, %v536_v46, 0.0  ;;  %v549_v29 = vrot.slane %v535_v44, 7  ;;  %v553_v43 = vrot.slane %v535_v44, 1  ;;  %v585_v28 = vmul.f32 %v535_v44, %v1988_v24 }
  0xab   : > { %v548_v6 = vrot.slane %v537_v32, 7  ;;  %v552_v18 = vrot.slane %v537_v32, 1  ;;  %v584_v54 = vmul.f32 %v537_v32, %v1985_v23  ;;  %v2318_v44 = vmul.f32 %v2279_v7, %v2169_v12 }
  0xac   : > { %v551_v21 = vsel %vm519_vm0, %v549_v29, 0.0  ;;  %v555_v31 = vsel %vm520_vm1, %v553_v43, 0.0  ;;  %v2314_v46 = vadd.f32 %v2031_v37, %v585_v28  ;;  %v2333_v12 = vmul.f32 %v2267_v22, %v2076_v52 }
  0xad   : > { %v550_v32 = vsel %vm519_vm0, %v548_v6, 0.0  ;;  %v554_v13 = vsel %vm520_vm1, %v552_v18, 0.0  ;;  %v573_v63 = vmul.f32 %v551_v21, %v1974_v19  ;;  %v2326_v29 = vadd.f32 %v2027_v35, %v584_v54 }
  0xae   : > { %3193 = vst [vmem:[#allocation77_spill] sm:$0xff] %v2314_v46  ;;  %v572_v43 = vmul.f32 %v550_v32, %v1961_v15  ;;  %v596_v28 = vmul.f32 %v554_v13, %v1991_v25  ;;  %v597_v37 = vmul.f32 %v555_v31, %v1994_v26  ;;  %v611_v46 = vpop.permute.xlu0 %610  ;;  %v2344_v35 = vmul.f32 %v2271_v4, %v2041_v40 }
  0xaf   : > { %3194 = vst [vmem:[#allocation78_spill] sm:$0xff] %v2326_v29  ;;  %v2336_v6 = vadd.f32 %v2024_v34, %v573_v63  ;;  %v614_v18 = vsel %vm534_vm2, %v611_v46, %v613_v16  ;;  %v615_v21 = vsel %vm534_vm2, %v613_v16, %v611_v46 }
  0xb0   : > { %v2347_v13 = vadd.f32 %v2020_v33, %v572_v43  ;;  %v2350_v31 = vadd.f32 %v2061_v47, %v596_v28  ;;  %v2353_v54 = vadd.f32 %v2065_v48, %v597_v37  ;;  %v616_v34 = vsel %vm515_vm3, %v615_v21, 0.0 }
  0xb1   : > { %3195 = vst [vmem:[#allocation79_spill] sm:$0xff] %v2336_v6  ;;  %v626_v63 = vrot.slane %v616_v34, 7  ;;  %v627_v32 = vrot.slane %v614_v18, 7  ;;  %v630_v52 = vrot.slane %v616_v34, 1  ;;  %v631_v16 = vrot.slane %v614_v18, 1 }
  0xb2   : > { %3196 = vst [vmem:[#allocation80_spill] sm:$0xff] %v2347_v13  ;;  %v662_v46 = vmul.f32 %v616_v34, %v2044_v41  ;;  %v663_v40 = vmul.f32 %v614_v18, %v2079_v53  ;;  %v779_v33 = vmul.f32 %v616_v34, %v1985_v23  ;;  %v780_v43 = vmul.f32 %v614_v18, %v1988_v24 }
  0xb3   : > { %3197 = vst [vmem:[#allocation81_spill] sm:$0xff] %v2350_v31  ;;  %v628_v47 = vsel %vm519_vm0, %v626_v63, 0.0  ;;  %v629_v48 = vsel %vm519_vm0, %v627_v32, 0.0  ;;  %v632_v28 = vsel %vm520_vm1, %v630_v52, 0.0  ;;  %v633_v37 = vsel %vm520_vm1, %v631_v16, 0.0  ;;  %v690_v31 = vpop.permute.xlu1 %689 }
  0xb4   : > { %3198 = vst [vmem:[#allocation82_spill] sm:$0xff] %v2353_v54  ;;  %v650_v21 = vmul.f32 %v628_v47, %v2068_v49  ;;  %v651_v54 = vmul.f32 %v629_v48, %v2071_v50  ;;  %v2372_v34 = vadd.f32 %v2102_v61, %v662_v46  ;;  %v2375_v18 = vadd.f32 %v2106_v62, %v663_v40  ;;  %v692_v62 = vpop.permute.xlu2 %691  ;;  %v3204_v46 = vld [vmem:[#allocation49_spill] sm:$0xff] }
  0xb5   : > { %v674_v63 = vmul.f32 %v632_v28, %v2085_v55  ;;  %v675_v32 = vmul.f32 %v633_v37, %v2088_v56  ;;  %v767_v6 = vmul.f32 %v628_v47, %v1961_v15  ;;  %v768_v52 = vmul.f32 %v629_v48, %v1974_v19  ;;  %v3206_v47 = vld [vmem:[#allocation46_spill] sm:$0xff] }
  0xb6   : > { %3199 = vst [vmem:[#allocation83_spill] sm:$0xff] %v2372_v34  ;;  %v2382_v16 = vadd.f32 %v2137_v38, %v650_v21  ;;  %v2385_v13 = vadd.f32 %v2094_v58, %v651_v54  ;;  %v2388_v61 = vadd.f32 %v2113_v0, %v779_v33  ;;  %v2391_v40 = vadd.f32 %v2122_v11, %v780_v43  ;;  %v3208_v48 = vld [vmem:[#allocation50_spill] sm:$0xff]  ;;  %v3210_v38 = vld [vmem:[#allocation45_spill] sm:$0xff] }
  0xb7   : > { %3200 = vst [vmem:[#allocation84_spill] sm:$0xff] %v2375_v18  ;;  %v2394_v18 = vadd.f32 %v3204_v46, %v674_v63  ;;  %v2397_v34 = vadd.f32 %v3206_v47, %v675_v32  ;;  %v2400_v29 = vadd.f32 %v3208_v48, %v767_v6  ;;  %v2403_v21 = vadd.f32 %v3210_v38, %v768_v52  ;;  %v3212_v32 = vld [vmem:[#allocation51_spill] sm:$0xff]  ;;  %v3214_v46 = vld [vmem:[#allocation58_spill] sm:$0xff] }
  0xb8   : > { %3201 = vst [vmem:[#allocation85_spill] sm:$0xff] %v2385_v13  ;;  %v791_v58 = vmul.f32 %v632_v28, %v1991_v25  ;;  %v792_v0 = vmul.f32 %v633_v37, %v1994_v26  ;;  %v693_v11 = vsel %vm534_vm2, %v690_v31, %v692_v62  ;;  %v694_v54 = vsel %vm534_vm2, %v692_v62, %v690_v31 }
  0xb9   : > { %3202 = vst [vmem:[#allocation86_spill] sm:$0xff] %v2388_v61  ;;  %v695_v33 = vsel %vm515_vm3, %v694_v54, 0.0  ;;  %v706_v43 = vrot.slane %v693_v11, 7  ;;  %v710_v63 = vrot.slane %v693_v11, 1  ;;  %v742_v6 = vmul.f32 %v693_v11, %v2180_v45 }
  0xba   : > { %3203 = vst [vmem:[#allocation87_spill] sm:$0xff] %v2391_v40  ;;  %v2415_v52 = vadd.f32 %v3212_v32, %v791_v58  ;;  %v2418_v28 = vadd.f32 %v3214_v46, %v792_v0  ;;  %v705_v37 = vrot.slane %v695_v33, 7  ;;  %v709_v47 = vrot.slane %v695_v33, 1  ;;  %v3217_v46 = vld [vmem:[#allocation60_spill] sm:$0xff] }
  0xbb   : > { %3205 = vst [vmem:[#allocation49_spill] sm:$0xff] %v2394_v18  ;;  %v708_v48 = vsel %vm519_vm0, %v706_v43, 0.0  ;;  %v712_v31 = vsel %vm520_vm1, %v710_v63, 0.0  ;;  %v741_v62 = vmul.f32 %v695_v33, %v2189_v1  ;;  %v2426_v38 = vadd.f32 %v2209_v39, %v742_v6  ;;  %v3220_v63 = vld [vmem:[#allocation63_spill] sm:$0xff]  ;;  %v3221_v6 = vld [vmem:[#allocation66_spill] sm:$0xff]  ;;  %v3226_v18 = vld [vmem:[#allocation68_spill] sm:$0xff] }
  0xbc   : > { %3207 = vst [vmem:[#allocation46_spill] sm:$0xff] %v2397_v34  ;;  %v707_v58 = vsel %vm519_vm0, %v705_v37, 0.0  ;;  %v711_v0 = vsel %vm520_vm1, %v709_v47, 0.0  ;;  %v730_v54 = vmul.f32 %v708_v48, %v2186_v9  ;;  %v754_v32 = vmul.f32 %v712_v31, %v2195_v14  ;;  %v3223_v37 = vld [vmem:[#allocation69_spill] sm:$0xff] }
  0xbd   : > { %3209 = vst [vmem:[#allocation50_spill] sm:$0xff] %v2400_v29  ;;  %v729_v43 = vmul.f32 %v707_v58, %v3217_v46  ;;  %v753_v40 = vmul.f32 %v711_v0, %v3220_v63  ;;  %v803_v39 = vmul.f32 %v707_v58, %v2068_v49  ;;  %v804_v47 = vmul.f32 %v708_v48, %v2071_v50  ;;  %v3225_v29 = vld [vmem:[#allocation65_spill] sm:$0xff] }
  0xbe   : > { %3211 = vst [vmem:[#allocation45_spill] sm:$0xff] %v2403_v21  ;;  %v2444_v61 = vadd.f32 %v3223_v37, %v754_v32  ;;  %v815_v21 = vmul.f32 %v695_v33, %v2044_v41  ;;  %v816_v13 = vmul.f32 %v693_v11, %v2079_v53  ;;  %v3230_v32 = vld [vmem:[#allocation72_spill] sm:$0xff] }
  0xbf   : > { %3213 = vst [vmem:[#allocation51_spill] sm:$0xff] %v2415_v52  ;;  %v2449_v34 = vadd.f32 %v3225_v29, %v729_v43  ;;  %v933_v43 = vmul.f32 %v695_v33, %v1985_v23 }
  0xc0   : > { %3215 = vst [vmem:[#allocation58_spill] sm:$0xff] %v2418_v28  ;;  %v3218_v28 = vld [vmem:[#allocation67_spill] sm:$0xff]  ;;  %v2462_v37 = vadd.f32 %v3230_v32, %v815_v21  ;;  %v2467_v29 = vadd.f32 %v2229_v51, %v816_v13  ;;  %v945_v32 = vmul.f32 %v711_v0, %v1991_v25 }
  0xc1   : > { %3216 = vst [vmem:[#allocation88_spill] sm:$0xff] %v2426_v38  ;;  %v2436_v52 = vadd.f32 %v3218_v28, %v741_v62  ;;  %v2441_v38 = vadd.f32 %v3221_v6, %v730_v54  ;;  %v2452_v28 = vadd.f32 %v3226_v18, %v753_v40  ;;  %v3227_v62 = vld [vmem:[#allocation70_spill] sm:$0xff]  ;;  %v3228_v54 = vld [vmem:[#allocation71_spill] sm:$0xff]  ;;  %v921_v18 = vmul.f32 %v707_v58, %v1961_v15 }
  0xc2   : > { %3224 = vst [vmem:[#allocation69_spill] sm:$0xff] %v2444_v61  ;;  %v2459_v6 = vadd.f32 %v3228_v54, %v804_v47  ;;  %v827_v61 = vmul.f32 %v711_v0, %v2085_v55  ;;  %v922_v40 = vmul.f32 %v708_v48, %v1974_v19  ;;  %v934_v54 = vmul.f32 %v693_v11, %v1988_v24  ;;  %v3232_v48 = vld [vmem:[#allocation74_spill] sm:$0xff] }
  0xc3   : > { %3219 = vst [vmem:[#allocation67_spill] sm:$0xff] %v2436_v52  ;;  %v2455_v52 = vadd.f32 %v3227_v62, %v803_v39  ;;  %v845_v39 = vpop.permute.xlu0 %844  ;;  %v3231_v62 = vld [vmem:[#allocation73_spill] sm:$0xff]  ;;  %v2481_v51 = vadd.f32 %v2238_v36, %v921_v18  ;;  %v2487_v33 = vadd.f32 %v2253_v59, %v933_v43 }
  0xc4   : > { %3222 = vst [vmem:[#allocation66_spill] sm:$0xff] %v2441_v38  ;;  %v828_v38 = vmul.f32 %v712_v31, %v2088_v56  ;;  %v2473_v47 = vadd.f32 %v3231_v62, %v827_v61  ;;  %v2484_v13 = vadd.f32 %v2241_v42, %v922_v40  ;;  %v946_v61 = vmul.f32 %v712_v31, %v1994_v26 }
  0xc5   : > { %3229 = vst [vmem:[#allocation65_spill] sm:$0xff] %v2459_v6  ;;  %v843_v6 = vpop.permute.xlu2 %842  ;;  %v2491_v58 = vadd.f32 %v3232_v48, %v934_v54 }
  0xc6   : > { %v2476_v21 = vadd.f32 %v2235_v2, %v828_v38  ;;  %v2494_v2 = vadd.f32 %v2256_v60, %v945_v32  ;;  %v846_v11 = vsel %vm534_vm2, %v843_v6, %v845_v39  ;;  %v847_v36 = vsel %vm534_vm2, %v845_v39, %v843_v6 }
  0xc7   : > { %v2501_v42 = vadd.f32 %v2259_v17, %v946_v61  ;;  %v848_v59 = vsel %vm515_vm3, %v847_v36, 0.0  ;;  %v859_v38 = vrot.slane %v846_v11, 7  ;;  %v863_v31 = vrot.slane %v846_v11, 1 }
  0xc8   : > { %v858_v0 = vrot.slane %v848_v59, 7  ;;  %v862_v18 = vrot.slane %v848_v59, 1  ;;  %v894_v40 = vmul.f32 %v848_v59, %v2189_v1  ;;  %v895_v60 = vmul.f32 %v846_v11, %v2180_v45  ;;  %v3271_v1 = vld [vmem:[#allocation34_spill] sm:$0xff] }
  0xc9   : > { %v861_v43 = vsel %vm519_vm0, %v859_v38, 0.0  ;;  %v865_v6 = vsel %vm520_vm1, %v863_v31, 0.0  ;;  %v969_v17 = vmul.f32 %v848_v59, %v2044_v41  ;;  %v970_v39 = vmul.f32 %v846_v11, %v2079_v53 }
  0xca   : > { %v860_v62 = vsel %vm519_vm0, %v858_v0, 0.0  ;;  %v864_v54 = vsel %vm520_vm1, %v862_v18, 0.0  ;;  %v883_v32 = vmul.f32 %v861_v43, %v2186_v9  ;;  %v2519_v61 = vadd.f32 %v2283_v27, %v894_v40  ;;  %v3236_v27 = vld [vmem:[#allocation36_spill] sm:$0xff] }
  0xcb   : > { %v882_v48 = vmul.f32 %v860_v62, %v3217_v46  ;;  %v2523_v36 = vadd.f32 %v2263_v3, %v895_v60  ;;  %v906_v38 = vmul.f32 %v864_v54, %v3220_v63  ;;  %v907_v31 = vmul.f32 %v865_v6, %v2195_v14  ;;  %v3240_v14 = vld [vmem:[#allocation76_spill] sm:$0xff]  ;;  %v621_v46 = vpop.permute.xlu0 %620 }
  0xcc   : > { %3233 = vst [vmem:[#allocation68_spill] sm:$0xff] %v2519_v61  ;;  %v2529_v0 = vadd.f32 %v2299_v8, %v883_v32  ;;  %v957_v18 = vmul.f32 %v860_v62, %v2068_v49  ;;  %v958_v53 = vmul.f32 %v861_v43, %v2071_v50  ;;  %v972_v40 = vmul.f32 %v1932_v5, %v3236_v27 }
  0xcd   : > { %3234 = vst [vmem:[#allocation70_spill] sm:$0xff] %v2523_v36  ;;  %v2536_v41 = vadd.f32 %v2295_v57, %v882_v48  ;;  %v2539_v3 = vadd.f32 %v2307_v20, %v906_v38  ;;  %v2542_v60 = vadd.f32 %v2318_v44, %v907_v31  ;;  %v2545_v63 = vadd.f32 %v3240_v14, %v969_v17  ;;  %v3245_v20 = vld [vmem:[#allocation44_spill] sm:$0xff]  ;;  %v3246_v38 = vld [vmem:[#allocation75_spill] sm:$0xff]  ;;  %v3247_v44 = vld [vmem:[#allocation41_spill] sm:$0xff] }
  0xce   : > { %3235 = vst [vmem:[#allocation71_spill] sm:$0xff] %v2529_v0  ;;  %v2548_v8 = vadd.f32 %v2333_v12, %v957_v18  ;;  %v2551_v32 = vadd.f32 %v2344_v35, %v958_v53  ;;  %v2553_v50 = vadd.f32 %v972_v40, %v970_v39  ;;  %v981_v57 = vmul.f32 %v864_v54, %v2085_v55  ;;  %v3248_v17 = vld [vmem:[#allocation21_spill] sm:$0xff]  ;;  %v3249_v35 = vld [vmem:[#allocation22_spill] sm:$0xff]  ;;  %v3252_v55 = vld [vmem:[#allocation23_spill] sm:$0xff] }
  0xcf   : > { %3237 = vst [vmem:[#allocation72_spill] sm:$0xff] %v2536_v41  ;;  %v982_v48 = vmul.f32 %v865_v6, %v2088_v56  ;;  %v983_v27 = vmul.f32 %v3246_v38, %v3245_v20  ;;  %v984_v31 = vmul.f32 %v2279_v7, %v3247_v44  ;;  %v1075_v14 = vmul.f32 %v860_v62, %v1961_v15  ;;  %v3253_v44 = vld [vmem:[#allocation18_spill] sm:$0xff]  ;;  %v1562_v15 = vpop.permute.xlu1 %1561 }
  0xd0   : > { %3238 = vst [vmem:[#allocation73_spill] sm:$0xff] %v2539_v3  ;;  %v1076_v12 = vmul.f32 %v861_v43, %v1974_v19  ;;  %v1077_v53 = vmul.f32 %v2267_v22, %v3248_v17  ;;  %v1078_v39 = vmul.f32 %v2271_v4, %v3249_v35  ;;  %v1087_v18 = vmul.f32 %v848_v59, %v1985_v23  ;;  %v3256_v22 = vld [vmem:[#allocation24_spill] sm:$0xff]  ;;  %v3266_v17 = vld [vmem:[#allocation30_spill] sm:$0xff]  ;;  %v3281_v3 = vld [vmem:[#allocation85_spill] sm:$0xff] }
  0xd1   : > { %3239 = vst [vmem:[#allocation74_spill] sm:$0xff] %v2542_v60  ;;  %v2568_v40 = vadd.f32 %v983_v27, %v981_v57  ;;  %v2570_v56 = vadd.f32 %v984_v31, %v982_v48  ;;  %v1088_v20 = vmul.f32 %v846_v11, %v1988_v24  ;;  %v1089_v49 = vmul.f32 %v3253_v44, %v3252_v55  ;;  %v3258_v27 = vld [vmem:[#allocation27_spill] sm:$0xff]  ;;  %v3259_v11 = vld [vmem:[#allocation28_spill] sm:$0xff] }
  0xd2   : > { %3241 = vst [vmem:[#allocation76_spill] sm:$0xff] %v2545_v63  ;;  %v2575_v62 = vadd.f32 %v1077_v53, %v1075_v14  ;;  %v2577_v19 = vadd.f32 %v1078_v39, %v1076_v12  ;;  %v1090_v43 = vmul.f32 %v1932_v5, %v3256_v22  ;;  %v1099_v4 = vmul.f32 %v864_v54, %v1991_v25  ;;  %v504_v5 = vld [vmem:[%s3032_s1] sm:$0x3]  ;;  %v3264_v54 = vld [vmem:[#allocation20_spill] sm:$0xff] }
  0xd3   : > { %3242 = vst [vmem:[#allocation89_spill] sm:$0xff] %v2548_v8  ;;  %v2582_v23 = vadd.f32 %v1089_v49, %v1087_v18  ;;  %v1100_v59 = vmul.f32 %v865_v6, %v1994_v26  ;;  %v1101_v24 = vmul.f32 %v3246_v38, %v3258_v27  ;;  %v1102_v55 = vmul.f32 %v2279_v7, %v3259_v11  ;;  %v3263_v49 = vld [vmem:[#allocation19_spill] sm:$0xff]  ;;  %v3265_v14 = vld [vmem:[#allocation26_spill] sm:$0xff] }
  0xd4   : > { %3243 = vst [vmem:[#allocation90_spill] sm:$0xff] %v2551_v32  ;;  %v2589_v57 = vadd.f32 %v1090_v43, %v1088_v20  ;;  %v2592_v48 = vadd.s32 128, %v2007_v30  ;;  %v1564_v44 = vunpack.i.h.bf16 %v1562_v15  ;;  %v1563_v31 = vunpack.i.l.bf16 %v1562_v15  ;;  %v3280_v32 = vld [vmem:[#allocation84_spill] sm:$0xff] }
  0xd5   : > { %3244 = vst [vmem:[#allocation91_spill] sm:$0xff] %v2553_v50  ;;  %v2597_v25 = vadd.f32 %v1101_v24, %v1099_v4  ;;  %v2599_v26 = vadd.f32 %v1102_v55, %v1100_v59  ;;  %v2602_v6 = vperm.slane %v3263_v49, 2  ;;  %v2605_v7 = vperm.slane %v3264_v54, 2 }
  0xd6   : > { %3250 = vst [vmem:[#allocation75_spill] sm:$0xff] %v2568_v40  ;;  %vm518_vm5 = vcmp.lt.s32.totalorder %v2592_v48, 224  ;;  %v2609_v20 = vperm.slane %v3263_v49, 5  ;;  %v2612_v38 = vperm.slane %v3264_v54, 5  ;;  %v2615_v12 = vperm.slane %v3265_v14, 0 }
  0xd7   : > { %3251 = vst [vmem:[#allocation21_spill] sm:$0xff] %v2570_v56  ;;  %v2618_v53 = vperm.slane %v3266_v17, 0  ;;  %v2620_v35 = vperm.slane %v504_v5, 0  ;;  %v2622_v39 = vperm.slane %v504_v5, 1  ;;  %v544_v18 = vsel %vm543_vm4, %v1563_v31, %v1564_v44 }
  0xd8   : > { %3254 = vst [vmem:[#allocation22_spill] sm:$0xff] %v2575_v62  ;;  %v545_v15 = vsel %vm543_vm4, %v1564_v44, %v1563_v31  ;;  %v564_v22 = vrot.slane %v544_v18, 7  ;;  %v568_v43 = vrot.slane %v544_v18, 1  ;;  %v590_v4 = vmul.f32 %v544_v18, %v2609_v20  ;;  %v3269_v18 = vld [vmem:[#allocation78_spill] sm:$0xff]  ;;  %v3277_v62 = vld [vmem:[#allocation79_spill] sm:$0xff] }
  0xd9   : > { %3255 = vst [vmem:[#allocation23_spill] sm:$0xff] %v2577_v19  ;;  %v547_v59 = vsel %vm518_vm5, %v545_v15, 0.0  ;;  %v2632_v27 = vperm.slane %v3265_v14, 3  ;;  %v2635_v24 = vperm.slane %v3266_v17, 3  ;;  %v2638_v11 = vperm.slane %v3265_v14, 6 }
  0xda   : > { %3257 = vst [vmem:[#allocation18_spill] sm:$0xff] %v2582_v23  ;;  %v565_v55 = vrot.slane %v547_v59, 7  ;;  %v566_v44 = vsel %vm519_vm0, %v564_v22, 0.0  ;;  %v569_v31 = vrot.slane %v547_v59, 1  ;;  %v570_v5 = vsel %vm520_vm1, %v568_v43, 0.0  ;;  %v3275_v23 = vld [vmem:[#allocation31_spill] sm:$0xff] }
  0xdb   : > { %3260 = vst [vmem:[#allocation24_spill] sm:$0xff] %v2589_v57  ;;  %v578_v49 = vmul.f32 %v566_v44, %v2602_v6  ;;  %v591_v54 = vmul.f32 %v547_v59, %v2612_v38  ;;  %v592_v15 = vadd.f32 %v590_v4, %v3269_v18  ;;  %v602_v45 = vmul.f32 %v570_v5, %v2615_v12  ;;  %v3272_v59 = vld [vmem:[#allocation80_spill] sm:$0xff]  ;;  %v3273_v4 = vld [vmem:[#allocation77_spill] sm:$0xff] }
  0xdc   : > { %3261 = vst [vmem:[#allocation27_spill] sm:$0xff] %v2597_v25  ;;  %v567_v14 = vsel %vm519_vm0, %v565_v55, 0.0  ;;  %v571_v9 = vsel %vm520_vm1, %v569_v31, 0.0  ;;  %v2653_v22 = vperm.slane %v3266_v17, 6  ;;  %v2656_v43 = vperm.slane %v3271_v1, 1  ;;  %v619_v25 = vpop.permute.xlu2 %618  ;;  %v3274_v57 = vld [vmem:[#allocation81_spill] sm:$0xff] }
  0xdd   : > { %3262 = vst [vmem:[#allocation28_spill] sm:$0xff] %v2599_v26  ;;  %v579_v44 = vmul.f32 %v567_v14, %v2605_v7  ;;  %v580_v26 = vadd.f32 %v578_v49, %v3272_v59  ;;  %v593_v18 = vadd.f32 %v591_v54, %v3273_v4  ;;  %v603_v5 = vmul.f32 %v571_v9, %v2618_v53  ;;  %v3278_v59 = vld [vmem:[#allocation82_spill] sm:$0xff] }
  0xde   : > { %3267 = vst [vmem:[#allocation19_spill] sm:$0xff] %v2635_v24  ;;  %v604_v55 = vadd.f32 %v602_v45, %v3274_v57  ;;  %v2664_v19 = vperm.slane %v3275_v23, 1  ;;  %v622_v17 = vsel %vm543_vm4, %v619_v25, %v621_v46  ;;  %v623_v31 = vsel %vm543_vm4, %v621_v46, %v619_v25 }
  0xdf   : > { %3268 = vst [vmem:[#allocation20_spill] sm:$0xff] %v2638_v11  ;;  %v581_v14 = vadd.f32 %v579_v44, %v3277_v62  ;;  %v582_v49 = vadd.f32 %v580_v26, %v2620_v35  ;;  %v605_v54 = vadd.f32 %v603_v5, %v3278_v59  ;;  %v625_v9 = vsel %vm518_vm5, %v623_v31, 0.0 }
  0xe0   : > { %3270 = vst [vmem:[#allocation26_spill] sm:$0xff] %v2653_v22  ;;  %v642_v4 = vrot.slane %v622_v17, 7  ;;  %v643_v45 = vrot.slane %v625_v9, 7  ;;  %v646_v57 = vrot.slane %v622_v17, 1  ;;  %v647_v56 = vrot.slane %v625_v9, 1 }
  0xe1   : > { %3276 = vst [vmem:[#allocation30_spill] sm:$0xff] %v2664_v19  ;;  %v583_v40 = vadd.f32 %v581_v14, %v2622_v39  ;;  %v594_v50 = vadd.f32 %v592_v15, %v582_v49  ;;  %v668_v63 = vmul.f32 %v622_v17, %v2638_v11  ;;  %v669_v46 = vmul.f32 %v625_v9, %v2653_v22  ;;  %v3279_v49 = vld [vmem:[#allocation83_spill] sm:$0xff] }
  0xe2   : > { %v644_v62 = vsel %vm519_vm0, %v642_v4, 0.0  ;;  %v645_v25 = vsel %vm519_vm0, %v643_v45, 0.0  ;;  %v648_v26 = vsel %vm520_vm1, %v646_v57, 0.0  ;;  %v649_v44 = vsel %vm520_vm1, %v647_v56, 0.0 }
  0xe3   : > { %v595_v5 = vadd.f32 %v593_v18, %v583_v40  ;;  %v606_v31 = vadd.f32 %v604_v55, %v594_v50  ;;  %v656_v15 = vmul.f32 %v644_v62, %v2632_v27  ;;  %v657_v14 = vmul.f32 %v645_v25, %v2635_v24  ;;  %v3282_v50 = vld [vmem:[#allocation49_spill] sm:$0xff]  ;;  %v3283_v18 = vld [vmem:[#allocation46_spill] sm:$0xff] }
  0xe4   : > { %v670_v59 = vadd.f32 %v668_v63, %v3279_v49  ;;  %v671_v8 = vadd.f32 %v669_v46, %v3280_v32  ;;  %v680_v4 = vmul.f32 %v648_v26, %v2656_v43  ;;  %v681_v45 = vmul.f32 %v649_v44, %v2664_v19  ;;  %v3284_v49 = vld [vmem:[#allocation50_spill] sm:$0xff] }
  0xe5   : > { %v607_v60 = vadd.f32 %v605_v54, %v595_v5  ;;  %v658_v57 = vadd.f32 %v656_v15, %v2382_v16  ;;  %v659_v36 = vadd.f32 %v657_v14, %v3281_v3  ;;  %v773_v56 = vmul.f32 %v644_v62, %v2602_v6  ;;  %v3285_v5 = vld [vmem:[#allocation45_spill] sm:$0xff]  ;;  %v3286_v15 = vld [vmem:[#allocation86_spill] sm:$0xff] }
  0xe6   : > { %v682_v40 = vadd.f32 %v680_v4, %v3282_v50  ;;  %v683_v55 = vadd.f32 %v681_v45, %v3283_v18  ;;  %v774_v0 = vmul.f32 %v645_v25, %v2605_v7  ;;  %v785_v63 = vmul.f32 %v622_v17, %v2609_v20  ;;  %v3287_v50 = vld [vmem:[#allocation87_spill] sm:$0xff] }
  0xe7   : > { %v660_v32 = vadd.f32 %v658_v57, %v606_v31  ;;  %v661_v46 = vadd.f32 %v659_v36, %v607_v60  ;;  %v775_v41 = vadd.f32 %v773_v56, %v3284_v49  ;;  %v786_v54 = vmul.f32 %v625_v9, %v2612_v38  ;;  %v3288_v60 = vld [vmem:[#allocation51_spill] sm:$0xff]  ;;  %v3289_v57 = vld [vmem:[#allocation58_spill] sm:$0xff]  ;;  %v698_v56 = vpop.permute.xlu1 %697 }
  0xe8   : > { %v776_v16 = vadd.f32 %v774_v0, %v3285_v5  ;;  %v787_v3 = vadd.f32 %v785_v63, %v3286_v15  ;;  %v797_v62 = vmul.f32 %v648_v26, %v2615_v12  ;;  %v798_v14 = vmul.f32 %v649_v44, %v2618_v53  ;;  %v700_v0 = vpop.permute.xlu2 %699  ;;  %v3292_v5 = vld [vmem:[#allocation48_spill] sm:$0xff] }
  0xe9   : > { %v672_v4 = vadd.f32 %v670_v59, %v660_v32  ;;  %v673_v45 = vadd.f32 %v671_v8, %v661_v46  ;;  %v777_v25 = vadd.f32 %v775_v41, %v2620_v35  ;;  %v788_v17 = vadd.f32 %v786_v54, %v3287_v50  ;;  %v3290_v46 = vld [vmem:[#allocation47_spill] sm:$0xff] }
  0xea   : > { %v778_v36 = vadd.f32 %v776_v16, %v2622_v39  ;;  %v799_v31 = vadd.f32 %v797_v62, %v3288_v60  ;;  %v800_v9 = vadd.f32 %v798_v14, %v3289_v57  ;;  %v2711_v18 = vperm.slane %v3271_v1, 4 }
  0xeb   : > { %v684_v26 = vadd.f32 %v682_v40, %v672_v4  ;;  %v685_v63 = vadd.f32 %v683_v55, %v673_v45  ;;  %v789_v44 = vadd.f32 %v787_v3, %v777_v25  ;;  %v2714_v8 = vperm.slane %v3275_v23, 4 }
  0xec   : > { %v790_v41 = vadd.f32 %v788_v17, %v778_v36  ;;  %v2717_v59 = vperm.slane %v3271_v1, 7  ;;  %v2720_v32 = vperm.slane %v3275_v23, 7  ;;  %v2723_v49 = vperm.slane %v3290_v46, 2 }
  0xed   : > { %v801_v54 = vadd.f32 %v799_v31, %v789_v44  ;;  %v2726_v16 = vperm.slane %v3292_v5, 2  ;;  %v701_v40 = vsel %vm543_vm4, %v698_v56, %v700_v0  ;;  %v702_v55 = vsel %vm543_vm4, %v700_v0, %v698_v56  ;;  %v3295_v44 = vld [vmem:[#allocation88_spill] sm:$0xff] }
  0xee   : > { %3291 = vst [vmem:[#allocation78_spill] sm:$0xff] %v2723_v49  ;;  %v802_v15 = vadd.f32 %v800_v9, %v790_v41  ;;  %v704_v1 = vsel %vm518_vm5, %v702_v55, 0.0  ;;  %v721_v3 = vrot.slane %v701_v40, 7  ;;  %v725_v23 = vrot.slane %v701_v40, 1  ;;  %v3294_v9 = vld [vmem:[#allocation67_spill] sm:$0xff] }
  0xef   : > { %3293 = vst [vmem:[#allocation34_spill] sm:$0xff] %v2726_v16  ;;  %v722_v62 = vrot.slane %v704_v1, 7  ;;  %v726_v14 = vrot.slane %v704_v1, 1  ;;  %v747_v4 = vmul.f32 %v701_v40, %v2717_v59  ;;  %v748_v45 = vmul.f32 %v704_v1, %v2720_v32 }
  0xf0   : > { %v723_v25 = vsel %vm519_vm0, %v721_v3, 0.0  ;;  %v727_v50 = vsel %vm520_vm1, %v725_v23, 0.0  ;;  %v821_v17 = vmul.f32 %v701_v40, %v2638_v11  ;;  %v822_v36 = vmul.f32 %v704_v1, %v2653_v22 }
  0xf1   : > { %v724_v60 = vsel %vm519_vm0, %v722_v62, 0.0  ;;  %v728_v31 = vsel %vm520_vm1, %v726_v14, 0.0  ;;  %v735_v57 = vmul.f32 %v723_v25, %v2711_v18  ;;  %v749_v56 = vadd.f32 %v747_v4, %v3294_v9  ;;  %v3296_v14 = vld [vmem:[#allocation66_spill] sm:$0xff]  ;;  %v3297_v9 = vld [vmem:[#allocation69_spill] sm:$0xff] }
  0xf2   : > { %v736_v0 = vmul.f32 %v724_v60, %v2714_v8  ;;  %v750_v41 = vadd.f32 %v748_v45, %v3295_v44  ;;  %v759_v46 = vmul.f32 %v727_v50, %v2723_v49  ;;  %v760_v5 = vmul.f32 %v728_v31, %v2726_v16  ;;  %v3298_v16 = vld [vmem:[#allocation65_spill] sm:$0xff] }
  0xf3   : > { %v737_v55 = vadd.f32 %v735_v57, %v2449_v34  ;;  %v809_v3 = vmul.f32 %v723_v25, %v2632_v27  ;;  %v810_v23 = vmul.f32 %v724_v60, %v2635_v24  ;;  %v823_v62 = vadd.f32 %v821_v17, %v2462_v37 }
  0xf4   : > { %v738_v22 = vadd.f32 %v736_v0, %v3296_v14  ;;  %v761_v4 = vadd.f32 %v759_v46, %v2452_v28  ;;  %v762_v11 = vadd.f32 %v760_v5, %v3297_v9  ;;  %v824_v45 = vadd.f32 %v822_v36, %v2467_v29 }
  0xf5   : > { %v739_v44 = vadd.f32 %v737_v55, %v684_v26  ;;  %v811_v49 = vadd.f32 %v809_v3, %v2455_v52  ;;  %v812_v61 = vadd.f32 %v810_v23, %v3298_v16  ;;  %v833_v34 = vmul.f32 %v727_v50, %v2656_v43  ;;  %v853_v55 = vpop.permute.xlu1 %852 }
  0xf6   : > { %v740_v57 = vadd.f32 %v738_v22, %v685_v63  ;;  %v834_v24 = vmul.f32 %v728_v31, %v2664_v19  ;;  %v927_v37 = vmul.f32 %v723_v25, %v2602_v6  ;;  %v928_v17 = vmul.f32 %v724_v60, %v2605_v7 }
  0xf7   : > { %v751_v0 = vadd.f32 %v749_v56, %v739_v44  ;;  %v813_v28 = vadd.f32 %v811_v49, %v801_v54  ;;  %v814_v46 = vadd.f32 %v812_v61, %v802_v15  ;;  %v835_v29 = vadd.f32 %v833_v34, %v2473_v47  ;;  %v851_v54 = vpop.permute.xlu0 %850 }
  0xf8   : > { %v752_v26 = vadd.f32 %v750_v41, %v740_v57  ;;  %v836_v52 = vadd.f32 %v834_v24, %v2476_v21  ;;  %v929_v16 = vadd.f32 %v927_v37, %v2481_v51  ;;  %v930_v36 = vadd.f32 %v928_v17, %v2484_v13  ;;  %v3299_v17 = vld [vmem:[#allocation68_spill] sm:$0xff] }
  0xf9   : > { %v763_v22 = vadd.f32 %v761_v4, %v751_v0  ;;  %v825_v63 = vadd.f32 %v823_v62, %v813_v28  ;;  %v826_v5 = vadd.f32 %v824_v45, %v814_v46  ;;  %v939_v25 = vmul.f32 %v701_v40, %v2609_v20  ;;  %v3300_v28 = vld [vmem:[#allocation72_spill] sm:$0xff] }
  0xfa   : > { %v764_v60 = vadd.f32 %v762_v11, %v752_v26  ;;  %v931_v49 = vadd.f32 %v929_v16, %v2620_v35  ;;  %v932_v61 = vadd.f32 %v930_v36, %v2622_v39  ;;  %v940_v47 = vmul.f32 %v704_v1, %v2612_v38 }
  0xfb   : > { %765 = vst [vmem:[%s2776_s24] sm:$0xff] %v763_v22  ;;  %v837_v21 = vadd.f32 %v835_v29, %v825_v63  ;;  %v838_v51 = vadd.f32 %v836_v52, %v826_v5  ;;  %v941_v13 = vadd.f32 %v939_v25, %v2487_v33  ;;  %v951_v24 = vmul.f32 %v727_v50, %v2615_v12  ;;  %v3301_v29 = vld [vmem:[#allocation78_spill] sm:$0xff]  ;;  %v3303_v22 = vld [vmem:[#allocation71_spill] sm:$0xff] }
  0xfc   : > { %766 = vst [vmem:[%s2776_s24 + $0x8] sm:$0xff] %v764_v60  ;;  %v942_v11 = vadd.f32 %v940_v47, %v2491_v58  ;;  %v952_v40 = vmul.f32 %v728_v31, %v2618_v53  ;;  %v854_v15 = vsel %vm543_vm4, %v851_v54, %v853_v55  ;;  %v855_v1 = vsel %vm543_vm4, %v853_v55, %v851_v54  ;;  %v3302_v52 = vld [vmem:[#allocation34_spill] sm:$0xff]  ;;  %v3305_v55 = vld [vmem:[#allocation19_spill] sm:$0xff] }
  0xfd   : > { %v943_v56 = vadd.f32 %v941_v13, %v931_v49  ;;  %v953_v41 = vadd.f32 %v951_v24, %v2494_v2  ;;  %v857_v33 = vsel %vm518_vm5, %v855_v1, 0.0  ;;  %v874_v3 = vrot.slane %v854_v15, 7  ;;  %v3304_v5 = vld [vmem:[#allocation70_spill] sm:$0xff]  ;;  %v3306_v49 = vld [vmem:[#allocation20_spill] sm:$0xff]  ;;  %v3307_v13 = vld [vmem:[#allocation73_spill] sm:$0xff] }
  0xfe   : > { %v944_v50 = vadd.f32 %v942_v11, %v932_v61  ;;  %v954_v23 = vadd.f32 %v952_v40, %v2501_v42  ;;  %v875_v62 = vrot.slane %v857_v33, 7  ;;  %v878_v58 = vrot.slane %v854_v15, 1  ;;  %v3308_v54 = vld [vmem:[#allocation74_spill] sm:$0xff]  ;;  %v3309_v40 = vld [vmem:[#allocation89_spill] sm:$0xff] }
  0xff   : > { %v955_v14 = vadd.f32 %v953_v41, %v943_v56  ;;  %v876_v31 = vsel %vm519_vm0, %v874_v3, 0.0  ;;  %v879_v4 = vrot.slane %v857_v33, 1  ;;  %v900_v9 = vmul.f32 %v854_v15, %v2717_v59  ;;  %v3310_v41 = vld [vmem:[#allocation90_spill] sm:$0xff] }
 0x100   : > { %v956_v45 = vadd.f32 %v954_v23, %v944_v50  ;;  %v877_v2 = vsel %vm519_vm0, %v875_v62, 0.0  ;;  %v880_v44 = vsel %vm520_vm1, %v878_v58, 0.0  ;;  %v888_v34 = vmul.f32 %v876_v31, %v2711_v18  ;;  %v3311_v50 = vld [vmem:[#allocation26_spill] sm:$0xff]  ;;  %v3312_v62 = vld [vmem:[#allocation76_spill] sm:$0xff] }
 0x101   : > { %v881_v42 = vsel %vm520_vm1, %v879_v4, 0.0  ;;  %v889_v57 = vmul.f32 %v877_v2, %v2714_v8  ;;  %v901_v37 = vmul.f32 %v857_v33, %v2720_v32  ;;  %v902_v0 = vadd.f32 %v900_v9, %v3299_v17  ;;  %v3313_v17 = vld [vmem:[#allocation91_spill] sm:$0xff] }
 0x102   : > { %v890_v46 = vadd.f32 %v888_v34, %v3300_v28  ;;  %v912_v26 = vmul.f32 %v880_v44, %v3301_v29  ;;  %v913_v16 = vmul.f32 %v881_v42, %v3302_v52  ;;  %v963_v36 = vmul.f32 %v876_v31, %v2632_v27 }
 0x103   : > { %v891_v63 = vadd.f32 %v889_v57, %v3303_v22  ;;  %v903_v25 = vadd.f32 %v901_v37, %v3304_v5  ;;  %v964_v60 = vmul.f32 %v877_v2, %v3305_v55  ;;  %v975_v61 = vmul.f32 %v854_v15, %v3306_v49  ;;  %v3316_v5 = vld [vmem:[#allocation22_spill] sm:$0xff] }
 0x104   : > { %v892_v47 = vadd.f32 %v890_v46, %v837_v21  ;;  %v914_v24 = vadd.f32 %v912_v26, %v3307_v13  ;;  %v915_v11 = vadd.f32 %v913_v16, %v3308_v54  ;;  %v965_v1 = vadd.f32 %v963_v36, %v3309_v40  ;;  %v3314_v16 = vld [vmem:[#allocation75_spill] sm:$0xff]  ;;  %v1575_v54 = vld [vmem:[%s1909_s22 + $0x30] sm:$0xff]  ;;  %v1576_v40 = vld [vmem:[%s1909_s22 + $0x38] sm:$0xff] }
 0x105   : > { %v893_v56 = vadd.f32 %v891_v63, %v838_v51  ;;  %v966_v3 = vadd.f32 %v964_v60, %v3310_v41  ;;  %v976_v23 = vmul.f32 %v857_v33, %v3311_v50  ;;  %v977_v58 = vadd.f32 %v975_v61, %v3312_v62  ;;  %v3319_v41 = vld [vmem:[#allocation24_spill] sm:$0xff] }
 0x106   : > { %v904_v4 = vadd.f32 %v902_v0, %v892_v47  ;;  %v967_v9 = vadd.f32 %v965_v1, %v955_v14  ;;  %v987_v34 = vmul.f32 %v880_v44, %v2656_v43  ;;  %v988_v21 = vmul.f32 %v881_v42, %v2664_v19  ;;  %v3315_v0 = vld [vmem:[#allocation21_spill] sm:$0xff]  ;;  %v3317_v47 = vld [vmem:[#allocation23_spill] sm:$0xff]  ;;  %v3318_v1 = vld [vmem:[#allocation18_spill] sm:$0xff] }
 0x107   : > { %v905_v57 = vadd.f32 %v903_v25, %v893_v56  ;;  %v968_v37 = vadd.f32 %v966_v3, %v956_v45  ;;  %v978_v28 = vadd.f32 %v976_v23, %v3313_v17  ;;  %v1081_v51 = vmul.f32 %v876_v31, %v2602_v6 }
 0x108   : > { %v916_v46 = vadd.f32 %v914_v24, %v904_v4  ;;  %v2823_v26 = vadd.f32 %v977_v58, %v967_v9  ;;  %v2826_v36 = vadd.f32 %v987_v34, %v3314_v16  ;;  %v2829_v14 = vadd.f32 %v988_v21, %v3315_v0  ;;  %v3323_v0 = vld [vmem:[#allocation53_spill] sm:$0xff] }
 0x109   : > { %v917_v22 = vadd.f32 %v915_v11, %v905_v57  ;;  %v2831_v63 = vadd.f32 %v978_v28, %v968_v37  ;;  %v1082_v45 = vmul.f32 %v877_v2, %v2605_v7  ;;  %v1083_v25 = vadd.f32 %v1081_v51, %v3316_v5  ;;  %v999_v2 = vpop.permute.xlu0 %998 }
 0x10a   : > { %1457 = vst [vmem:[%s2776_s24 + $0x10] sm:$0xff] %v916_v46  ;;  %v1093_v6 = vmul.f32 %v854_v15, %v2609_v20  ;;  %v1094_v31 = vmul.f32 %v857_v33, %v2612_v38  ;;  %v1105_v60 = vmul.f32 %v880_v44, %v2615_v12  ;;  %v1106_v61 = vmul.f32 %v881_v42, %v2618_v53  ;;  %v3320_v15 = vld [vmem:[#allocation27_spill] sm:$0xff]  ;;  %v3321_v12 = vld [vmem:[#allocation28_spill] sm:$0xff]  ;;  %v997_v44 = vpop.permute.xlu2 %996 }
 0x10b   : > { %1458 = vst [vmem:[%s2776_s24 + $0x18] sm:$0xff] %v917_v22  ;;  %v1084_v13 = vadd.f32 %v1082_v45, %v3317_v47  ;;  %v1085_v24 = vadd.f32 %v1083_v25, %v2620_v35  ;;  %v1020_v11 = vrot.slane %v1575_v54, 7  ;;  %v1021_v7 = vrot.slane %v1576_v40, 7  ;;  %v3322_v46 = vld [vmem:[#allocation52_spill] sm:$0xff]  ;;  %v3324_v45 = vld [vmem:[#allocation62_spill] sm:$0xff] }
 0x10c   : > { %v1095_v56 = vadd.f32 %v1093_v6, %v3318_v1  ;;  %v1096_v20 = vadd.f32 %v1094_v31, %v3319_v41  ;;  %v2848_v38 = vadd.f32 %v1105_v60, %v3320_v15  ;;  %v2851_v33 = vadd.f32 %v1106_v61, %v3321_v12  ;;  %v3325_v60 = vld [vmem:[#allocation61_spill] sm:$0xff]  ;;  %v3326_v47 = vld [vmem:[#allocation60_spill] sm:$0xff]  ;;  %v3329_v1 = vld [vmem:[#allocation55_spill] sm:$0xff] }
 0x10d   : > { %v1086_v53 = vadd.f32 %v1084_v13, %v2622_v39  ;;  %v1022_v35 = vsel %vm519_vm0, %v1020_v11, 0.0  ;;  %v1023_v42 = vsel %vm519_vm0, %v1021_v7, 0.0  ;;  %v1024_v3 = vrot.slane %v1575_v54, 1  ;;  %v3328_v7 = vld [vmem:[#allocation54_spill] sm:$0xff]  ;;  %v3331_v12 = vld [vmem:[#allocation64_spill] sm:$0xff] }
 0x10e   : > { %v2858_v23 = vadd.f32 %v1095_v56, %v1085_v24  ;;  %v1025_v62 = vrot.slane %v1576_v40, 1  ;;  %v1000_v58 = vsel %vm534_vm2, %v997_v44, %v999_v2  ;;  %v1001_v4 = vsel %vm534_vm2, %v999_v2, %v997_v44  ;;  %v3327_v24 = vld [vmem:[#allocation59_spill] sm:$0xff]  ;;  %v3332_v44 = vld [vmem:[#allocation56_spill] sm:$0xff] }
 0x10f   : > { %v2864_v9 = vadd.f32 %v1096_v20, %v1086_v53  ;;  %v1026_v39 = vsel %vm520_vm1, %v1024_v3, 0.0  ;;  %v1002_v34 = vsel %vm515_vm3, %v1001_v4, 0.0  ;;  %v1013_v21 = vrot.slane %v1000_v58, 7  ;;  %v3330_v20 = vld [vmem:[#allocation63_spill] sm:$0xff] }
 0x110   : > { %v1027_v57 = vsel %vm520_vm1, %v1025_v62, 0.0  ;;  %v1012_v37 = vrot.slane %v1002_v34, 7  ;;  %v1016_v17 = vrot.slane %v1002_v34, 1  ;;  %v1017_v28 = vrot.slane %v1000_v58, 1 }
 0x111   : > { %v1015_v51 = vsel %vm519_vm0, %v1013_v21, 0.0  ;;  %v1038_v16 = vmul.f32 %v1022_v35, %v3322_v46  ;;  %v1039_v22 = vmul.f32 %v1023_v42, %v3323_v0  ;;  %v1048_v5 = vmul.f32 %v1002_v34, %v3324_v45  ;;  %v3334_v45 = vld [vmem:[#allocation37_spill] sm:$0xff] }
 0x112   : > { %v1014_v25 = vsel %vm519_vm0, %v1012_v37, 0.0  ;;  %v1018_v6 = vsel %vm520_vm1, %v1016_v17, 0.0  ;;  %v1019_v31 = vsel %vm520_vm1, %v1017_v28, 0.0  ;;  %v1037_v61 = vmul.f32 %v1015_v51, %v3325_v60  ;;  %v3333_v37 = vld [vmem:[#allocation57_spill] sm:$0xff] }
 0x113   : > { %v1036_v13 = vmul.f32 %v1014_v25, %v3326_v47  ;;  %v1049_v11 = vmul.f32 %v1000_v58, %v3327_v24  ;;  %v1050_v2 = vmul.f32 %v1575_v54, %v3328_v7  ;;  %v1051_v56 = vmul.f32 %v1576_v40, %v3329_v1  ;;  %v3335_v24 = vld [vmem:[#allocation38_spill] sm:$0xff]  ;;  %v3336_v7 = vld [vmem:[#allocation39_spill] sm:$0xff] }
 0x114   : > { %v1041_v41 = vadd.f32 %v1039_v22, %v1037_v61  ;;  %v1060_v15 = vmul.f32 %v1018_v6, %v3330_v20  ;;  %v1061_v53 = vmul.f32 %v1019_v31, %v3331_v12  ;;  %v1062_v3 = vmul.f32 %v1026_v39, %v3332_v44  ;;  %v3337_v22 = vld [vmem:[#allocation32_spill] sm:$0xff]  ;;  %v3338_v20 = vld [vmem:[#allocation33_spill] sm:$0xff] }
 0x115   : > { %v1040_v62 = vadd.f32 %v1038_v16, %v1036_v13  ;;  %v1052_v4 = vadd.f32 %v1050_v2, %v1048_v5  ;;  %v1053_v21 = vadd.f32 %v1051_v56, %v1049_v11  ;;  %v1063_v17 = vmul.f32 %v1027_v57, %v3333_v37  ;;  %v3339_v12 = vld [vmem:[#allocation40_spill] sm:$0xff]  ;;  %v3340_v16 = vld [vmem:[#allocation35_spill] sm:$0xff]  ;;  %v3342_v2 = vld [vmem:[#allocation42_spill] sm:$0xff] }
 0x116   : > { %v1064_v28 = vadd.f32 %v1062_v3, %v1060_v15  ;;  %v1111_v47 = vmul.f32 %v1014_v25, %v3334_v45  ;;  %v1112_v46 = vmul.f32 %v1015_v51, %v3335_v24  ;;  %v1113_v0 = vmul.f32 %v1022_v35, %v3336_v7  ;;  %v3341_v13 = vld [vmem:[#allocation36_spill] sm:$0xff]  ;;  %v1005_v15 = vpop.permute.xlu1 %1004  ;;  %v1007_v45 = vpop.permute.xlu2 %1006  ;;  %v3343_v51 = vld [vmem:[#allocation43_spill] sm:$0xff] }
 0x117   : > { %v1065_v1 = vadd.f32 %v1063_v17, %v1061_v53  ;;  %v1114_v61 = vmul.f32 %v1023_v42, %v3337_v22  ;;  %v1123_v60 = vmul.f32 %v1002_v34, %v3338_v20  ;;  %v1124_v19 = vmul.f32 %v1000_v58, %v3339_v12  ;;  %v3344_v35 = vld [vmem:[#allocation44_spill] sm:$0xff]  ;;  %v3345_v53 = vld [vmem:[#allocation41_spill] sm:$0xff] }
 0x118   : > { %v1115_v44 = vadd.f32 %v1113_v0, %v1111_v47  ;;  %v1125_v5 = vmul.f32 %v1575_v54, %v3340_v16  ;;  %v1126_v11 = vmul.f32 %v1576_v40, %v3341_v13  ;;  %v1135_v56 = vmul.f32 %v1018_v6, %v3342_v2 }
 0x119   : > { %v1116_v25 = vadd.f32 %v1114_v61, %v1112_v46  ;;  %v1136_v24 = vmul.f32 %v1019_v31, %v3343_v51  ;;  %v1137_v7 = vmul.f32 %v1026_v39, %v3344_v35  ;;  %v1138_v42 = vmul.f32 %v1027_v57, %v3345_v53 }
 0x11a   : > { %v1127_v3 = vadd.f32 %v1125_v5, %v1123_v60  ;;  %v1128_v34 = vadd.f32 %v1126_v11, %v1124_v19  ;;  %v991_v58 = vadd.f32 %v2826_v36, %v2823_v26  ;;  %v992_v54 = vadd.f32 %v2829_v14, %v2831_v63 }
 0x11b   : > { %v1139_v40 = vadd.f32 %v1137_v7, %v1135_v56  ;;  %v1140_v0 = vadd.f32 %v1138_v42, %v1136_v24  ;;  %v1008_v6 = vsel %vm543_vm4, %v1005_v15, %v1007_v45  ;;  %v1009_v46 = vsel %vm543_vm4, %v1007_v45, %v1005_v15 }
 0x11c   : > { %v1011_v39 = vsel %vm518_vm5, %v1009_v46, 0.0  ;;  %v1028_v57 = vrot.slane %v1008_v6, 7  ;;  %v1032_v31 = vrot.slane %v1008_v6, 1  ;;  %v1054_v19 = vmul.f32 %v1008_v6, %v2717_v59 }
 0x11d   : > { %v1029_v60 = vrot.slane %v1011_v39, 7  ;;  %v1033_v26 = vrot.slane %v1011_v39, 1  ;;  %v1055_v36 = vmul.f32 %v1011_v39, %v2720_v32  ;;  %v1109_v14 = vadd.f32 %v2848_v38, %v2858_v23 }
 0x11e   : > { %v1030_v63 = vsel %vm519_vm0, %v1028_v57, 0.0  ;;  %v1034_v47 = vsel %vm520_vm1, %v1032_v31, 0.0  ;;  %v1056_v20 = vadd.f32 %v1054_v19, %v1052_v4  ;;  %v1110_v12 = vadd.f32 %v2851_v33, %v2864_v9 }
 0x11f   : > { %v1031_v17 = vsel %vm519_vm0, %v1029_v60, 0.0  ;;  %v1035_v22 = vsel %vm520_vm1, %v1033_v26, 0.0  ;;  %v1042_v61 = vmul.f32 %v1030_v63, %v2711_v18  ;;  %v1057_v16 = vadd.f32 %v1055_v36, %v1053_v21  ;;  %v1567_v21 = vpop.permute.xlu0 %1566  ;;  %v1572_v36 = vpop.permute.xlu1 %1571 }
 0x120   : > { %v1043_v38 = vmul.f32 %v1031_v17, %v2714_v8  ;;  %v1066_v23 = vmul.f32 %v1034_v47, %v3301_v29  ;;  %v1067_v5 = vmul.f32 %v1035_v22, %v3302_v52  ;;  %v1117_v4 = vmul.f32 %v1030_v63, %v2632_v27 }
 0x121   : > { %v1044_v13 = vadd.f32 %v1042_v61, %v1040_v62  ;;  %v1118_v33 = vmul.f32 %v1031_v17, %v3305_v55  ;;  %v1129_v9 = vmul.f32 %v1008_v6, %v3306_v49  ;;  %v1130_v11 = vmul.f32 %v1011_v39, %v3311_v50  ;;  %v3346_v62 = vld [vmem:[#allocation30_spill] sm:$0xff] }
 0x122   : > { %v1045_v2 = vadd.f32 %v1043_v38, %v1041_v41  ;;  %v1068_v56 = vadd.f32 %v1066_v23, %v1064_v28  ;;  %v1069_v15 = vadd.f32 %v1067_v5, %v1065_v1  ;;  %v1119_v45 = vadd.f32 %v1117_v4, %v1115_v44  ;;  %v3351_v38 = vld [vmem:[#allocation60_spill] sm:$0xff] }
 0x123   : > { %v1046_v51 = vadd.f32 %v1044_v13, %v991_v58  ;;  %v1120_v24 = vadd.f32 %v1118_v33, %v1116_v25  ;;  %v1131_v35 = vadd.f32 %v1129_v9, %v1127_v3  ;;  %v1132_v7 = vadd.f32 %v1130_v11, %v1128_v34  ;;  %v3352_v13 = vld [vmem:[#allocation62_spill] sm:$0xff]  ;;  %v3353_v9 = vld [vmem:[#allocation59_spill] sm:$0xff] }
 0x124   : > { %v1047_v53 = vadd.f32 %v1045_v2, %v992_v54  ;;  %v1121_v42 = vadd.f32 %v1119_v45, %v1109_v14  ;;  %v1141_v27 = vmul.f32 %v1034_v47, %v2656_v43  ;;  %v1142_v46 = vmul.f32 %v1035_v22, %v3346_v62  ;;  %v3347_v14 = vld [vmem:[#allocation61_spill] sm:$0xff]  ;;  %v3350_v22 = vld [vmem:[#allocation52_spill] sm:$0xff]  ;;  %v3354_v2 = vld [vmem:[#allocation54_spill] sm:$0xff] }
 0x125   : > { %v1058_v55 = vadd.f32 %v1056_v20, %v1046_v51  ;;  %v1122_v49 = vadd.f32 %v1120_v24, %v1110_v12  ;;  %v1569_v6 = vunpack.i.h.bf16 %v1567_v21  ;;  %v1568_v50 = vunpack.i.l.bf16 %v1567_v21  ;;  %v3348_v47 = vld [vmem:[#allocation53_spill] sm:$0xff]  ;;  %v3356_v51 = vld [vmem:[#allocation63_spill] sm:$0xff] }
 0x126   : > { %v1059_v41 = vadd.f32 %v1057_v16, %v1047_v53  ;;  %v1133_v1 = vadd.f32 %v1131_v35, %v1121_v42  ;;  %v1143_v44 = vadd.f32 %v1141_v27, %v1139_v40  ;;  %v1144_v28 = vadd.f32 %v1142_v46, %v1140_v0  ;;  %v3349_v20 = vld [vmem:[#allocation25_spill] sm:$0xff]  ;;  %v3357_v53 = vld [vmem:[#allocation64_spill] sm:$0xff] }
 0x127   : > { %v1070_v58 = vadd.f32 %v1068_v56, %v1058_v55  ;;  %v1134_v25 = vadd.f32 %v1132_v7, %v1122_v49  ;;  %v1160_v3 = vsel %vm534_vm2, %v1568_v50, %v1569_v6  ;;  %v1161_v43 = vsel %vm534_vm2, %v1569_v6, %v1568_v50  ;;  %v3358_v49 = vld [vmem:[#allocation56_spill] sm:$0xff]  ;;  %v3359_v6 = vld [vmem:[#allocation29_spill] sm:$0xff] }
 0x128   : > { %v1071_v34 = vadd.f32 %v1069_v15, %v1059_v41  ;;  %v1145_v54 = vadd.f32 %v1143_v44, %v1133_v1  ;;  %v1162_v39 = vsel %vm515_vm3, %v1161_v43, 0.0  ;;  %v1173_v57 = vrot.slane %v1160_v3, 7  ;;  %v3355_v15 = vld [vmem:[#allocation55_spill] sm:$0xff] }
 0x129   : > { %1461 = vst [vmem:[%s2776_s24 + $0x20] sm:$0xff] %v1070_v58  ;;  %v1146_v31 = vadd.f32 %v1144_v28, %v1134_v25  ;;  %v1172_v19 = vrot.slane %v1162_v39, 7  ;;  %v1176_v0 = vrot.slane %v1162_v39, 1  ;;  %v1177_v60 = vrot.slane %v1160_v3, 1 }
 0x12a   : > { %1462 = vst [vmem:[%s2776_s24 + $0x28] sm:$0xff] %v1071_v34  ;;  %v1175_v40 = vsel %vm519_vm0, %v1173_v57, 0.0  ;;  %v1199_v12 = vmul.f32 %v3349_v20, %v3348_v47  ;;  %v1198_v61 = vmul.f32 %v3349_v20, %v3350_v22  ;;  %v1574_v5 = vunpack.i.h.bf16 %v1572_v36 }
 0x12b   : > { %v1174_v26 = vsel %vm519_vm0, %v1172_v19, 0.0  ;;  %v1197_v63 = vmul.f32 %v1175_v40, %v3347_v14  ;;  %v1178_v17 = vsel %vm520_vm1, %v1176_v0, 0.0  ;;  %v1179_v16 = vsel %vm520_vm1, %v1177_v60, 0.0 }
 0x12c   : > { %v1196_v23 = vmul.f32 %v1174_v26, %v3351_v38  ;;  %v1573_v4 = vunpack.i.l.bf16 %v1572_v36  ;;  %v1208_v33 = vmul.f32 %v1162_v39, %v3352_v13  ;;  %v1209_v11 = vmul.f32 %v1160_v3, %v3353_v9 }
 0x12d   : > { %v1210_v56 = vmul.f32 0.0, %v3354_v2  ;;  %v1211_v45 = vmul.f32 0.0, %v3355_v15  ;;  %v1201_v21 = vadd.f32 %v1199_v12, %v1197_v63  ;;  %v1220_v24 = vmul.f32 %v1178_v17, %v3356_v51 }
 0x12e   : > { %v1168_v35 = vsel %vm543_vm4, %v1573_v4, %v1574_v5  ;;  %v1169_v7 = vsel %vm543_vm4, %v1574_v5, %v1573_v4  ;;  %v1221_v42 = vmul.f32 %v1179_v16, %v3357_v53  ;;  %v1200_v55 = vadd.f32 %v1198_v61, %v1196_v23 }
 0x12f   : > { %v1171_v27 = vsel %vm518_vm5, %v1169_v7, 0.0  ;;  %v1188_v62 = vrot.slane %v1168_v35, 7  ;;  %v1192_v46 = vrot.slane %v1168_v35, 1  ;;  %v1222_v50 = vmul.f32 %v3359_v6, %v3358_v49 }
 0x130   : > { %v1189_v41 = vrot.slane %v1171_v27, 7  ;;  %v1193_v1 = vrot.slane %v1171_v27, 1  ;;  %v1212_v44 = vadd.f32 %v1210_v56, %v1208_v33  ;;  %v1223_v28 = vmul.f32 %v3359_v6, %v3333_v37 }
 0x131   : > { %v1190_v30 = vsel %vm519_vm0, %v1188_v62, 0.0  ;;  %v1194_v58 = vsel %vm520_vm1, %v1192_v46, 0.0  ;;  %v1214_v43 = vmul.f32 %v1168_v35, %v2717_v59  ;;  %v1213_v34 = vadd.f32 %v1211_v45, %v1209_v11 }
 0x132   : > { %v1191_v48 = vsel %vm519_vm0, %v1189_v41, 0.0  ;;  %v1195_v25 = vsel %vm520_vm1, %v1193_v1, 0.0  ;;  %v1202_v3 = vmul.f32 %v1190_v30, %v2711_v18  ;;  %v1215_v39 = vmul.f32 %v1171_v27, %v2720_v32 }
 0x133   : > { %v1203_v37 = vmul.f32 %v1191_v48, %v2714_v8  ;;  %v1224_v57 = vadd.f32 %v1222_v50, %v1220_v24  ;;  %v1226_v40 = vmul.f32 %v1194_v58, %v3301_v29  ;;  %v1225_v10 = vadd.f32 %v1223_v28, %v1221_v42 }
 0x134   : > { %v1204_v19 = vadd.f32 %v1202_v3, %v1200_v55  ;;  %v1227_v18 = vmul.f32 %v1195_v25, %v3302_v52  ;;  %v1216_v60 = vadd.f32 %v1214_v43, %v1212_v44  ;;  %v1217_v26 = vadd.f32 %v1215_v39, %v1213_v34 }
 0x135   : > { %v1205_v0 = vadd.f32 %v1203_v37, %v1201_v21  ;;  %v1228_v29 = vadd.f32 %v1226_v40, %v1224_v57 }
 0x136   : > { %v1206_v59 = vadd.f32 %v1204_v19, %v1145_v54  ;;  %v1229_v14 = vadd.f32 %v1227_v18, %v1225_v10 }
 0x137   : > { %v1207_v8 = vadd.f32 %v1205_v0, %v1146_v31 }
 0x138   : > { %v1218_v32 = vadd.f32 %v1216_v60, %v1206_v59 }
 0x139   : > { %v1219_v36 = vadd.f32 %v1217_v26, %v1207_v8 }
 0x13a   : > { %v1230_v63 = vadd.f32 %v1228_v29, %v1218_v32 }
 0x13b   : > { %v1231_v47 = vadd.f32 %v1229_v14, %v1219_v36 }
 0x13c   : > { %1463 = vst [vmem:[%s2776_s24 + $0x30] sm:$0xff] %v1230_v63 }
 0x13d   : > { %1464 = vst [vmem:[%s2776_s24 + $0x38] sm:$0xff] %v1231_v47 }
 0x13e   : > { %1694 = shalt.err (!%p1691_p13)
}
 0x13f   : > { %s1760_s9 = smov 256   ;;  %s1761_s17 = smov 16  }
 0x140   : > { %1482 = dma.vmem_to_hbm [thread:$0]  (%p1847_p9), %s1254_s10, 1024, %s1256_s12, %s1236_s29, %s1760_s9, %s1760_s9, %s1761_s17  }
 0x141 PF: > { %s3361_s28 = sld [smem:[#allocation14_spill]]  ;;  %s1270_s3 = sand.u32 1, %s1733_s18  }
 0x142   : > { %p1495_p0 = pnand %p1438_p12, %p1854_p11  ;;  %s1271_s20 = scalar_lea.sflag [#allocation4], %s1270_s3 }
 0x144   : > { %p1496_p1 = pneg %p1495_p0 }
 0x146   : > { %1728 = dma.done.wait (%p1496_p1), %s1271_s20, 1024  }
 0x147   : > { %1730 = vsyncadd (%p1496_p1), %s1271_s20, 4294966272  ;;  %s24_s23 = sadd.s32 1, %s3361_s28   ;;  %s3362_s7 = sld [smem:[#allocation12_spill]] }
 0x148   : > { %p21_p2 = scmp.ge.s32.totalorder %s24_s23, 4   ;;  %s3363_s20 = sld [smem:[#allocation16_spill]] }
 0x149   : > { %s3364_s21 = sld [smem:[#allocation13_spill]]  ;;  %s3366_s18 = smov %s1737_s19 }
 0x14a   : > { %s3365_s22 = sld [smem:[#allocation15_spill]]  ;;  %23 = sbr.rel (!%p21_p2) target bundleno = 10 (0xa), region = 121 }
 0x14d   : > { %s3367_s19 = smov %s3362_s7 }
 0x14f   :  { %1277 = vsyncpa [#allocation3], 1 }
 0x150   :  { %1279 = vsyncpa [#allocation3 + $0x1], 1 }
 0x151   :  { %1280 = vsyncpa [#allocation6], 1 }
 0x152   :  { %1282 = vsyncpa [#allocation6 + $0x1], 1 }
 0x153   :  { %1283 = vsyncpa [#allocation4], 1 }
 0x154   :  { %1285 = vsyncpa [#allocation4 + $0x1], 1 }

</bundles_post_ra>
